<compile_context>
chip_gen: v7x
topology: tpu7x:2x2x1
jax: 0.10.0
libtpu: 0.0.40
codegen_flags: <defaults>
</compile_context>

<pallas_src>
import functools

import jax
import jax.numpy as jnp
from jax import lax
from jax.experimental import pallas as pl
from jax.experimental.pallas import tpu as pltpu


def _lstm_kernel(ids_ref, emb_hbm, wih_ref, whh_ref, b_ref, wp_ref, bp_ref,
                 out_ref, xbuf, sems, *, T, B, BP):
    H = whh_ref.shape[0]          # whh_ref: (H, 4H)
    four_h = whh_ref.shape[1]

    # ---- Fused embedding gather: start all T*B row DMAs immediately ---------
    copies = []
    for t in range(T):
        for b in range(B):
            n = t * B + b
            cp = pltpu.make_async_copy(
                emb_hbm.at[ids_ref[n]],          # (E,) row in HBM, dynamic id
                xbuf.at[t * BP + b],             # (E,) row in VMEM, static slot
                sems.at[n])
            cp.start()
            copies.append(cp)

    # ---- While the gathers fly: hoist every loop-invariant quantity ---------
    # sigmoid(x) = 0.5*tanh(x/2) + 0.5  -> per-lane scale/shift, one tanh/step.
    lane = lax.broadcasted_iota(jnp.int32, (BP, four_h), 1)
    is_g = jnp.logical_and(lane >= 2 * H, lane < 3 * H)   # g-gate lanes -> tanh
    scale = jnp.where(is_g, jnp.float32(1.0), jnp.float32(0.5))
    shift = jnp.where(is_g, jnp.float32(0.0), jnp.float32(0.5))
    whh = whh_ref[...]                                   # hoisted W_hh read
    wih = wih_ref[...]
    bias = b_ref[...]

    for cp in copies:
        cp.wait()

    # Zero the never-DMA'd pad rows (rows are independent; this just keeps the
    # padded lanes deterministic). Done on the value -> no store/DMA hazard.
    x_all = xbuf[...]                                    # (T*BP, E)
    row = lax.broadcasted_iota(jnp.int32, x_all.shape, 0)
    x_all = jnp.where((row % BP) < B, x_all, jnp.float32(0.0))

    # ---- Pre-pass: batched input projection for all timesteps (one MXU op),
    #      kept live in vregs (8 vregs at these shapes), no scratch round-trip.
    gx = jnp.dot(x_all, wih, preferred_element_type=jnp.float32) + bias

    # ---- Serial recurrence: one matmul + one gate-tanh + one cell-tanh/step -
    h = jnp.zeros((BP, H), jnp.float32)
    c = jnp.zeros((BP, H), jnp.float32)
    for t in range(T):                                   # unrolled, static slices
        gates = gx[t * BP:(t + 1) * BP, :] + jnp.dot(
            h, whh, preferred_element_type=jnp.float32)
        act = scale * jnp.tanh(gates * scale) + shift    # i,f,o: sigmoid; g: tanh
        i_g = act[:, 0 * H:1 * H]
        f_g = act[:, 1 * H:2 * H]
        g_g = act[:, 2 * H:3 * H]
        o_g = act[:, 3 * H:4 * H]
        c = f_g * c + i_g * g_g
        h = o_g * jnp.tanh(c)

    # ---- Fused lane-padded prediction head: (BP, H) @ (H, 128), unmasked vst -
    out_ref[...] = (jnp.dot(h, wp_ref[...], preferred_element_type=jnp.float32)
                    + bp_ref[...])


def lstm_classifier_pallas(seq_tokens, embedding, w_ih, w_hh, b_ih, b_hh,
                           w_pred, b_pred):
    """seq_tokens: (T, B) int32 token ids -> (B, 2) float32 logits."""
    T, B = seq_tokens.shape
    E = embedding.shape[1]
    four_h = w_ih.shape[0]
    H = four_h // 4
    n_out = w_pred.shape[0]

    # Pad batch to a full f32 sublane group (8 rows).
    BP = ((B + 7) // 8) * 8

    ids_flat = seq_tokens.reshape(T * B).astype(jnp.int32)

    # Weight layouts for the kernel.
    wih_t = w_ih.T.astype(jnp.float32)                         # (E, 4H)
    whh_t = w_hh.T.astype(jnp.float32)                         # (H, 4H)
    bias = (b_ih + b_hh).reshape(1, four_h).astype(jnp.float32)

    # Lane-pad the 2-logit head to 128 output columns for an unmasked store.
    NP = 128
    wp_pad = jnp.zeros((H, NP), jnp.float32).at[:, :n_out].set(w_pred.T)
    bp_pad = jnp.zeros((1, NP), jnp.float32).at[:, :n_out].set(b_pred)

    kernel = functools.partial(_lstm_kernel, T=T, B=B, BP=BP)
    vmem = pl.BlockSpec(memory_space=pltpu.MemorySpace.VMEM)

    out = pl.pallas_call(
        kernel,
        out_shape=jax.ShapeDtypeStruct((BP, NP), jnp.float32),
        in_specs=[
            pl.BlockSpec(memory_space=pltpu.MemorySpace.SMEM),   # token ids
            pl.BlockSpec(memory_space=pl.ANY),                   # embedding, HBM
            vmem,  # W_ih^T
            vmem,  # W_hh^T
            vmem,  # bias
            vmem,  # padded head weight
            vmem,  # padded head bias
        ],
        out_specs=vmem,
        scratch_shapes=[
            pltpu.VMEM((T * BP, E), jnp.float32),     # gathered embeddings
            pltpu.SemaphoreType.DMA((T * B,)),        # one sem per row DMA
        ],
    )(ids_flat, embedding.astype(jnp.float32), wih_t, whh_t, bias,
      wp_pad, bp_pad)

    return out[:B, :n_out]


def simple_lstm_forward(seq_tokens, params):
    """seq_tokens: (T, B) int32 token ids -> (B, 2) logits."""
    return lstm_classifier_pallas(
        seq_tokens,
        params["embedding"],
        params["w_ih"], params["w_hh"],
        params["b_ih"], params["b_hh"],
        params["w_pred"], params["b_pred"],
    )


def _reference_forward(seq_tokens, params):
    """Pure-JAX reference (same math) for a correctness check."""
    x_emb = params["embedding"][seq_tokens]
    T, B, E = x_emb.shape
    H = params["w_hh"].shape[1]
    wih_t = params["w_ih"].T
    whh_t = params["w_hh"].T
    bias = params["b_ih"] + params["b_hh"]

    def step(carry, x_t):
        h, c = carry
        gates = x_t @ wih_t + h @ whh_t + bias
        i = jax.nn.sigmoid(gates[:, 0 * H:1 * H])
        f = jax.nn.sigmoid(gates[:, 1 * H:2 * H])
        g = jnp.tanh(gates[:, 2 * H:3 * H])
        o = jax.nn.sigmoid(gates[:, 3 * H:4 * H])
        c = f * c + i * g
        h = o * jnp.tanh(c)
        return (h, c), None

    (h, _), _ = jax.lax.scan(step, (jnp.zeros((B, H)), jnp.zeros((B, H))),
                             x_emb)
    return h @ params["w_pred"].T + params["b_pred"]


if __name__ == "__main__":
    # Small shapes consistent with the module's forward.
    vocab_size = 20000
    embedding_dim = 32
    hidden_size = 32
    seq_len = 8
    batch = 2

    key = jax.random.PRNGKey(0)
    keys = jax.random.split(key, 8)
    k = 1.0 / jnp.sqrt(hidden_size)

    params = {
        # nn.Embedding: N(0, 1)
        "embedding": jax.random.normal(keys[0], (vocab_size, embedding_dim),
                                       jnp.float32),
        # nn.LSTM params (PyTorch gate order i,f,g,o), U(-1/sqrt(H), 1/sqrt(H))
        "w_ih": jax.random.uniform(keys[1], (4 * hidden_size, embedding_dim),
                                   jnp.float32, -k, k),
        "w_hh": jax.random.uniform(keys[2], (4 * hidden_size, hidden_size),
                                   jnp.float32, -k, k),
        "b_ih": jax.random.uniform(keys[3], (4 * hidden_size,),
                                   jnp.float32, -k, k),
        "b_hh": jax.random.uniform(keys[4], (4 * hidden_size,),
                                   jnp.float32, -k, k),
        # nn.Linear(hidden_size, 2)
        "w_pred": jax.random.uniform(keys[5], (2, hidden_size),
                                     jnp.float32, -k, k),
        "b_pred": jax.random.uniform(keys[6], (2,), jnp.float32, -k, k),
    }

    seq = jax.random.randint(keys[7], (seq_len, batch), 0, vocab_size,
                             dtype=jnp.int32)

    preds = simple_lstm_forward(seq, params)
    preds = jax.block_until_ready(preds)

    ref = _reference_forward(seq, params)
    assert preds.shape == (batch, 2)
    assert jnp.allclose(preds, ref, atol=2e-4, rtol=2e-4), (preds, ref)

    print("KERNEL_OK")
</pallas_src>

<mosaic_0001>
module attributes {stable_mosaic.version = 11 : i64} {
  func.func @_lstm_kernel(%arg0: memref<16xi32, #tpu.memory_space<smem>>, %arg1: memref<20000x32xf32, #tpu.memory_space<any>>, %arg2: memref<32x128xf32, #tpu.memory_space<vmem>>, %arg3: memref<32x128xf32, #tpu.memory_space<vmem>>, %arg4: memref<1x128xf32, #tpu.memory_space<vmem>>, %arg5: memref<32x128xf32, #tpu.memory_space<vmem>>, %arg6: memref<1x128xf32, #tpu.memory_space<vmem>>, %arg7: memref<8x128xf32, #tpu.memory_space<vmem>>, %arg8: memref<64x32xf32, #tpu.memory_space<vmem>>, %arg9: memref<16x!tpu.dma_semaphore, #tpu.memory_space<semaphore_mem>>) attributes {dimension_semantics = [], scalar_prefetch = 0 : i64, scratch_operands = 2 : i64, tpu.core_type = #tpu.core_type<tc>} {
    %c0 = arith.constant 0 : index
    %0 = memref.load %arg0[%c0] : memref<16xi32, #tpu.memory_space<smem>>
    %c0_i32 = arith.constant 0 : i32
    %c0_i32_0 = arith.constant 0 : i32
    %c0_i32_1 = arith.constant 0 : i32
    %1 = tpu.memref_slice %arg1[%0, %c0_i32_1] : memref<20000x32xf32, #tpu.memory_space<any>> -> memref<1x32xf32, #tpu.memory_space<any>>
    %2 = tpu.memref_squeeze %1 : memref<1x32xf32, #tpu.memory_space<any>> -> memref<32xf32, #tpu.memory_space<any>>
    %c0_i32_2 = arith.constant 0 : i32
    %3 = tpu.memref_slice %arg8[%c0_i32, %c0_i32_2] : memref<64x32xf32, #tpu.memory_space<vmem>> -> memref<1x32xf32, #tpu.memory_space<vmem>>
    %4 = tpu.memref_squeeze %3 : memref<1x32xf32, #tpu.memory_space<vmem>> -> memref<32xf32, #tpu.memory_space<vmem>>
    %5 = tpu.memref_slice %arg9[%c0_i32_0] : memref<16x!tpu.dma_semaphore, #tpu.memory_space<semaphore_mem>> -> memref<1x!tpu.dma_semaphore, #tpu.memory_space<semaphore_mem>>
    %6 = tpu.memref_squeeze %5 : memref<1x!tpu.dma_semaphore, #tpu.memory_space<semaphore_mem>> -> memref<!tpu.dma_semaphore, #tpu.memory_space<semaphore_mem>>
    tpu.enqueue_dma source(%2 : memref<32xf32, #tpu.memory_space<any>>) target(%4 : memref<32xf32, #tpu.memory_space<vmem>>) target_semaphore(%6 : memref<!tpu.dma_semaphore, #tpu.memory_space<semaphore_mem>>)
    %c1 = arith.constant 1 : index
    %7 = memref.load %arg0[%c1] : memref<16xi32, #tpu.memory_space<smem>>
    %c1_i32 = arith.constant 1 : i32
    %c1_i32_3 = arith.constant 1 : i32
    %c0_i32_4 = arith.constant 0 : i32
    %8 = tpu.memref_slice %arg1[%7, %c0_i32_4] : memref<20000x32xf32, #tpu.memory_space<any>> -> memref<1x32xf32, #tpu.memory_space<any>>
    %9 = tpu.memref_squeeze %8 : memref<1x32xf32, #tpu.memory_space<any>> -> memref<32xf32, #tpu.memory_space<any>>
    %c0_i32_5 = arith.constant 0 : i32
    %10 = tpu.memref_slice %arg8[%c1_i32, %c0_i32_5] : memref<64x32xf32, #tpu.memory_space<vmem>> -> memref<1x32xf32, #tpu.memory_space<vmem>>
    %11 = tpu.memref_squeeze %10 : memref<1x32xf32, #tpu.memory_space<vmem>> -> memref<32xf32, #tpu.memory_space<vmem>>
    %12 = tpu.memref_slice %arg9[%c1_i32_3] : memref<16x!tpu.dma_semaphore, #tpu.memory_space<semaphore_mem>> -> memref<1x!tpu.dma_semaphore, #tpu.memory_space<semaphore_mem>>
    %13 = tpu.memref_squeeze %12 : memref<1x!tpu.dma_semaphore, #tpu.memory_space<semaphore_mem>> -> memref<!tpu.dma_semaphore, #tpu.memory_space<semaphore_mem>>
    tpu.enqueue_dma source(%9 : memref<32xf32, #tpu.memory_space<any>>) target(%11 : memref<32xf32, #tpu.memory_space<vmem>>) target_semaphore(%13 : memref<!tpu.dma_semaphore, #tpu.memory_space<semaphore_mem>>)
    %c2 = arith.constant 2 : index
    %14 = memref.load %arg0[%c2] : memref<16xi32, #tpu.memory_space<smem>>
    %c8_i32 = arith.constant 8 : i32
    %c2_i32 = arith.constant 2 : i32
    %c0_i32_6 = arith.constant 0 : i32
    %15 = tpu.memref_slice %arg1[%14, %c0_i32_6] : memref<20000x32xf32, #tpu.memory_space<any>> -> memref<1x32xf32, #tpu.memory_space<any>>
    %16 = tpu.memref_squeeze %15 : memref<1x32xf32, #tpu.memory_space<any>> -> memref<32xf32, #tpu.memory_space<any>>
    %c0_i32_7 = arith.constant 0 : i32
    %17 = tpu.memref_slice %arg8[%c8_i32, %c0_i32_7] : memref<64x32xf32, #tpu.memory_space<vmem>> -> memref<1x32xf32, #tpu.memory_space<vmem>>
    %18 = tpu.memref_squeeze %17 : memref<1x32xf32, #tpu.memory_space<vmem>> -> memref<32xf32, #tpu.memory_space<vmem>>
    %19 = tpu.memref_slice %arg9[%c2_i32] : memref<16x!tpu.dma_semaphore, #tpu.memory_space<semaphore_mem>> -> memref<1x!tpu.dma_semaphore, #tpu.memory_space<semaphore_mem>>
    %20 = tpu.memref_squeeze %19 : memref<1x!tpu.dma_semaphore, #tpu.memory_space<semaphore_mem>> -> memref<!tpu.dma_semaphore, #tpu.memory_space<semaphore_mem>>
    tpu.enqueue_dma source(%16 : memref<32xf32, #tpu.memory_space<any>>) target(%18 : memref<32xf32, #tpu.memory_space<vmem>>) target_semaphore(%20 : memref<!tpu.dma_semaphore, #tpu.memory_space<semaphore_mem>>)
    %c3 = arith.constant 3 : index
    %21 = memref.load %arg0[%c3] : memref<16xi32, #tpu.memory_space<smem>>
    %c9_i32 = arith.constant 9 : i32
    %c3_i32 = arith.constant 3 : i32
    %c0_i32_8 = arith.constant 0 : i32
    %22 = tpu.memref_slice %arg1[%21, %c0_i32_8] : memref<20000x32xf32, #tpu.memory_space<any>> -> memref<1x32xf32, #tpu.memory_space<any>>
    %23 = tpu.memref_squeeze %22 : memref<1x32xf32, #tpu.memory_space<any>> -> memref<32xf32, #tpu.memory_space<any>>
    %c0_i32_9 = arith.constant 0 : i32
    %24 = tpu.memref_slice %arg8[%c9_i32, %c0_i32_9] : memref<64x32xf32, #tpu.memory_space<vmem>> -> memref<1x32xf32, #tpu.memory_space<vmem>>
    %25 = tpu.memref_squeeze %24 : memref<1x32xf32, #tpu.memory_space<vmem>> -> memref<32xf32, #tpu.memory_space<vmem>>
    %26 = tpu.memref_slice %arg9[%c3_i32] : memref<16x!tpu.dma_semaphore, #tpu.memory_space<semaphore_mem>> -> memref<1x!tpu.dma_semaphore, #tpu.memory_space<semaphore_mem>>
    %27 = tpu.memref_squeeze %26 : memref<1x!tpu.dma_semaphore, #tpu.memory_space<semaphore_mem>> -> memref<!tpu.dma_semaphore, #tpu.memory_space<semaphore_mem>>
    tpu.enqueue_dma source(%23 : memref<32xf32, #tpu.memory_space<any>>) target(%25 : memref<32xf32, #tpu.memory_space<vmem>>) target_semaphore(%27 : memref<!tpu.dma_semaphore, #tpu.memory_space<semaphore_mem>>)
    %c4 = arith.constant 4 : index
    %28 = memref.load %arg0[%c4] : memref<16xi32, #tpu.memory_space<smem>>
    %c16_i32 = arith.constant 16 : i32
    %c4_i32 = arith.constant 4 : i32
    %c0_i32_10 = arith.constant 0 : i32
    %29 = tpu.memref_slice %arg1[%28, %c0_i32_10] : memref<20000x32xf32, #tpu.memory_space<any>> -> memref<1x32xf32, #tpu.memory_space<any>>
    %30 = tpu.memref_squeeze %29 : memref<1x32xf32, #tpu.memory_space<any>> -> memref<32xf32, #tpu.memory_space<any>>
    %c0_i32_11 = arith.constant 0 : i32
    %31 = tpu.memref_slice %arg8[%c16_i32, %c0_i32_11] : memref<64x32xf32, #tpu.memory_space<vmem>> -> memref<1x32xf32, #tpu.memory_space<vmem>>
    %32 = tpu.memref_squeeze %31 : memref<1x32xf32, #tpu.memory_space<vmem>> -> memref<32xf32, #tpu.memory_space<vmem>>
    %33 = tpu.memref_slice %arg9[%c4_i32] : memref<16x!tpu.dma_semaphore, #tpu.memory_space<semaphore_mem>> -> memref<1x!tpu.dma_semaphore, #tpu.memory_space<semaphore_mem>>
    %34 = tpu.memref_squeeze %33 : memref<1x!tpu.dma_semaphore, #tpu.memory_space<semaphore_mem>> -> memref<!tpu.dma_semaphore, #tpu.memory_space<semaphore_mem>>
    tpu.enqueue_dma source(%30 : memref<32xf32, #tpu.memory_space<any>>) target(%32 : memref<32xf32, #tpu.memory_space<vmem>>) target_semaphore(%34 : memref<!tpu.dma_semaphore, #tpu.memory_space<semaphore_mem>>)
    %c5 = arith.constant 5 : index
    %35 = memref.load %arg0[%c5] : memref<16xi32, #tpu.memory_space<smem>>
    %c17_i32 = arith.constant 17 : i32
    %c5_i32 = arith.constant 5 : i32
    %c0_i32_12 = arith.constant 0 : i32
    %36 = tpu.memref_slice %arg1[%35, %c0_i32_12] : memref<20000x32xf32, #tpu.memory_space<any>> -> memref<1x32xf32, #tpu.memory_space<any>>
    %37 = tpu.memref_squeeze %36 : memref<1x32xf32, #tpu.memory_space<any>> -> memref<32xf32, #tpu.memory_space<any>>
    %c0_i32_13 = arith.constant 0 : i32
    %38 = tpu.memref_slice %arg8[%c17_i32, %c0_i32_13] : memref<64x32xf32, #tpu.memory_space<vmem>> -> memref<1x32xf32, #tpu.memory_space<vmem>>
    %39 = tpu.memref_squeeze %38 : memref<1x32xf32, #tpu.memory_space<vmem>> -> memref<32xf32, #tpu.memory_space<vmem>>
    %40 = tpu.memref_slice %arg9[%c5_i32] : memref<16x!tpu.dma_semaphore, #tpu.memory_space<semaphore_mem>> -> memref<1x!tpu.dma_semaphore, #tpu.memory_space<semaphore_mem>>
    %41 = tpu.memref_squeeze %40 : memref<1x!tpu.dma_semaphore, #tpu.memory_space<semaphore_mem>> -> memref<!tpu.dma_semaphore, #tpu.memory_space<semaphore_mem>>
    tpu.enqueue_dma source(%37 : memref<32xf32, #tpu.memory_space<any>>) target(%39 : memref<32xf32, #tpu.memory_space<vmem>>) target_semaphore(%41 : memref<!tpu.dma_semaphore, #tpu.memory_space<semaphore_mem>>)
    %c6 = arith.constant 6 : index
    %42 = memref.load %arg0[%c6] : memref<16xi32, #tpu.memory_space<smem>>
    %c24_i32 = arith.constant 24 : i32
    %c6_i32 = arith.constant 6 : i32
    %c0_i32_14 = arith.constant 0 : i32
    %43 = tpu.memref_slice %arg1[%42, %c0_i32_14] : memref<20000x32xf32, #tpu.memory_space<any>> -> memref<1x32xf32, #tpu.memory_space<any>>
    %44 = tpu.memref_squeeze %43 : memref<1x32xf32, #tpu.memory_space<any>> -> memref<32xf32, #tpu.memory_space<any>>
    %c0_i32_15 = arith.constant 0 : i32
    %45 = tpu.memref_slice %arg8[%c24_i32, %c0_i32_15] : memref<64x32xf32, #tpu.memory_space<vmem>> -> memref<1x32xf32, #tpu.memory_space<vmem>>
    %46 = tpu.memref_squeeze %45 : memref<1x32xf32, #tpu.memory_space<vmem>> -> memref<32xf32, #tpu.memory_space<vmem>>
    %47 = tpu.memref_slice %arg9[%c6_i32] : memref<16x!tpu.dma_semaphore, #tpu.memory_space<semaphore_mem>> -> memref<1x!tpu.dma_semaphore, #tpu.memory_space<semaphore_mem>>
    %48 = tpu.memref_squeeze %47 : memref<1x!tpu.dma_semaphore, #tpu.memory_space<semaphore_mem>> -> memref<!tpu.dma_semaphore, #tpu.memory_space<semaphore_mem>>
    tpu.enqueue_dma source(%44 : memref<32xf32, #tpu.memory_space<any>>) target(%46 : memref<32xf32, #tpu.memory_space<vmem>>) target_semaphore(%48 : memref<!tpu.dma_semaphore, #tpu.memory_space<semaphore_mem>>)
    %c7 = arith.constant 7 : index
    %49 = memref.load %arg0[%c7] : memref<16xi32, #tpu.memory_space<smem>>
    %c25_i32 = arith.constant 25 : i32
    %c7_i32 = arith.constant 7 : i32
    %c0_i32_16 = arith.constant 0 : i32
    %50 = tpu.memref_slice %arg1[%49, %c0_i32_16] : memref<20000x32xf32, #tpu.memory_space<any>> -> memref<1x32xf32, #tpu.memory_space<any>>
    %51 = tpu.memref_squeeze %50 : memref<1x32xf32, #tpu.memory_space<any>> -> memref<32xf32, #tpu.memory_space<any>>
    %c0_i32_17 = arith.constant 0 : i32
    %52 = tpu.memref_slice %arg8[%c25_i32, %c0_i32_17] : memref<64x32xf32, #tpu.memory_space<vmem>> -> memref<1x32xf32, #tpu.memory_space<vmem>>
    %53 = tpu.memref_squeeze %52 : memref<1x32xf32, #tpu.memory_space<vmem>> -> memref<32xf32, #tpu.memory_space<vmem>>
    %54 = tpu.memref_slice %arg9[%c7_i32] : memref<16x!tpu.dma_semaphore, #tpu.memory_space<semaphore_mem>> -> memref<1x!tpu.dma_semaphore, #tpu.memory_space<semaphore_mem>>
    %55 = tpu.memref_squeeze %54 : memref<1x!tpu.dma_semaphore, #tpu.memory_space<semaphore_mem>> -> memref<!tpu.dma_semaphore, #tpu.memory_space<semaphore_mem>>
    tpu.enqueue_dma source(%51 : memref<32xf32, #tpu.memory_space<any>>) target(%53 : memref<32xf32, #tpu.memory_space<vmem>>) target_semaphore(%55 : memref<!tpu.dma_semaphore, #tpu.memory_space<semaphore_mem>>)
    %c8 = arith.constant 8 : index
    %56 = memref.load %arg0[%c8] : memref<16xi32, #tpu.memory_space<smem>>
    %c32_i32 = arith.constant 32 : i32
    %c8_i32_18 = arith.constant 8 : i32
    %c0_i32_19 = arith.constant 0 : i32
    %57 = tpu.memref_slice %arg1[%56, %c0_i32_19] : memref<20000x32xf32, #tpu.memory_space<any>> -> memref<1x32xf32, #tpu.memory_space<any>>
    %58 = tpu.memref_squeeze %57 : memref<1x32xf32, #tpu.memory_space<any>> -> memref<32xf32, #tpu.memory_space<any>>
    %c0_i32_20 = arith.constant 0 : i32
    %59 = tpu.memref_slice %arg8[%c32_i32, %c0_i32_20] : memref<64x32xf32, #tpu.memory_space<vmem>> -> memref<1x32xf32, #tpu.memory_space<vmem>>
    %60 = tpu.memref_squeeze %59 : memref<1x32xf32, #tpu.memory_space<vmem>> -> memref<32xf32, #tpu.memory_space<vmem>>
    %61 = tpu.memref_slice %arg9[%c8_i32_18] : memref<16x!tpu.dma_semaphore, #tpu.memory_space<semaphore_mem>> -> memref<1x!tpu.dma_semaphore, #tpu.memory_space<semaphore_mem>>
    %62 = tpu.memref_squeeze %61 : memref<1x!tpu.dma_semaphore, #tpu.memory_space<semaphore_mem>> -> memref<!tpu.dma_semaphore, #tpu.memory_space<semaphore_mem>>
    tpu.enqueue_dma source(%58 : memref<32xf32, #tpu.memory_space<any>>) target(%60 : memref<32xf32, #tpu.memory_space<vmem>>) target_semaphore(%62 : memref<!tpu.dma_semaphore, #tpu.memory_space<semaphore_mem>>)
    %c9 = arith.constant 9 : index
    %63 = memref.load %arg0[%c9] : memref<16xi32, #tpu.memory_space<smem>>
    %c33_i32 = arith.constant 33 : i32
    %c9_i32_21 = arith.constant 9 : i32
    %c0_i32_22 = arith.constant 0 : i32
    %64 = tpu.memref_slice %arg1[%63, %c0_i32_22] : memref<20000x32xf32, #tpu.memory_space<any>> -> memref<1x32xf32, #tpu.memory_space<any>>
    %65 = tpu.memref_squeeze %64 : memref<1x32xf32, #tpu.memory_space<any>> -> memref<32xf32, #tpu.memory_space<any>>
    %c0_i32_23 = arith.constant 0 : i32
    %66 = tpu.memref_slice %arg8[%c33_i32, %c0_i32_23] : memref<64x32xf32, #tpu.memory_space<vmem>> -> memref<1x32xf32, #tpu.memory_space<vmem>>
    %67 = tpu.memref_squeeze %66 : memref<1x32xf32, #tpu.memory_space<vmem>> -> memref<32xf32, #tpu.memory_space<vmem>>
    %68 = tpu.memref_slice %arg9[%c9_i32_21] : memref<16x!tpu.dma_semaphore, #tpu.memory_space<semaphore_mem>> -> memref<1x!tpu.dma_semaphore, #tpu.memory_space<semaphore_mem>>
    %69 = tpu.memref_squeeze %68 : memref<1x!tpu.dma_semaphore, #tpu.memory_space<semaphore_mem>> -> memref<!tpu.dma_semaphore, #tpu.memory_space<semaphore_mem>>
    tpu.enqueue_dma source(%65 : memref<32xf32, #tpu.memory_space<any>>) target(%67 : memref<32xf32, #tpu.memory_space<vmem>>) target_semaphore(%69 : memref<!tpu.dma_semaphore, #tpu.memory_space<semaphore_mem>>)
    %c10 = arith.constant 10 : index
    %70 = memref.load %arg0[%c10] : memref<16xi32, #tpu.memory_space<smem>>
    %c40_i32 = arith.constant 40 : i32
    %c10_i32 = arith.constant 10 : i32
    %c0_i32_24 = arith.constant 0 : i32
    %71 = tpu.memref_slice %arg1[%70, %c0_i32_24] : memref<20000x32xf32, #tpu.memory_space<any>> -> memref<1x32xf32, #tpu.memory_space<any>>
    %72 = tpu.memref_squeeze %71 : memref<1x32xf32, #tpu.memory_space<any>> -> memref<32xf32, #tpu.memory_space<any>>
    %c0_i32_25 = arith.constant 0 : i32
    %73 = tpu.memref_slice %arg8[%c40_i32, %c0_i32_25] : memref<64x32xf32, #tpu.memory_space<vmem>> -> memref<1x32xf32, #tpu.memory_space<vmem>>
    %74 = tpu.memref_squeeze %73 : memref<1x32xf32, #tpu.memory_space<vmem>> -> memref<32xf32, #tpu.memory_space<vmem>>
    %75 = tpu.memref_slice %arg9[%c10_i32] : memref<16x!tpu.dma_semaphore, #tpu.memory_space<semaphore_mem>> -> memref<1x!tpu.dma_semaphore, #tpu.memory_space<semaphore_mem>>
    %76 = tpu.memref_squeeze %75 : memref<1x!tpu.dma_semaphore, #tpu.memory_space<semaphore_mem>> -> memref<!tpu.dma_semaphore, #tpu.memory_space<semaphore_mem>>
    tpu.enqueue_dma source(%72 : memref<32xf32, #tpu.memory_space<any>>) target(%74 : memref<32xf32, #tpu.memory_space<vmem>>) target_semaphore(%76 : memref<!tpu.dma_semaphore, #tpu.memory_space<semaphore_mem>>)
    %c11 = arith.constant 11 : index
    %77 = memref.load %arg0[%c11] : memref<16xi32, #tpu.memory_space<smem>>
    %c41_i32 = arith.constant 41 : i32
    %c11_i32 = arith.constant 11 : i32
    %c0_i32_26 = arith.constant 0 : i32
    %78 = tpu.memref_slice %arg1[%77, %c0_i32_26] : memref<20000x32xf32, #tpu.memory_space<any>> -> memref<1x32xf32, #tpu.memory_space<any>>
    %79 = tpu.memref_squeeze %78 : memref<1x32xf32, #tpu.memory_space<any>> -> memref<32xf32, #tpu.memory_space<any>>
    %c0_i32_27 = arith.constant 0 : i32
    %80 = tpu.memref_slice %arg8[%c41_i32, %c0_i32_27] : memref<64x32xf32, #tpu.memory_space<vmem>> -> memref<1x32xf32, #tpu.memory_space<vmem>>
    %81 = tpu.memref_squeeze %80 : memref<1x32xf32, #tpu.memory_space<vmem>> -> memref<32xf32, #tpu.memory_space<vmem>>
    %82 = tpu.memref_slice %arg9[%c11_i32] : memref<16x!tpu.dma_semaphore, #tpu.memory_space<semaphore_mem>> -> memref<1x!tpu.dma_semaphore, #tpu.memory_space<semaphore_mem>>
    %83 = tpu.memref_squeeze %82 : memref<1x!tpu.dma_semaphore, #tpu.memory_space<semaphore_mem>> -> memref<!tpu.dma_semaphore, #tpu.memory_space<semaphore_mem>>
    tpu.enqueue_dma source(%79 : memref<32xf32, #tpu.memory_space<any>>) target(%81 : memref<32xf32, #tpu.memory_space<vmem>>) target_semaphore(%83 : memref<!tpu.dma_semaphore, #tpu.memory_space<semaphore_mem>>)
    %c12 = arith.constant 12 : index
    %84 = memref.load %arg0[%c12] : memref<16xi32, #tpu.memory_space<smem>>
    %c48_i32 = arith.constant 48 : i32
    %c12_i32 = arith.constant 12 : i32
    %c0_i32_28 = arith.constant 0 : i32
    %85 = tpu.memref_slice %arg1[%84, %c0_i32_28] : memref<20000x32xf32, #tpu.memory_space<any>> -> memref<1x32xf32, #tpu.memory_space<any>>
    %86 = tpu.memref_squeeze %85 : memref<1x32xf32, #tpu.memory_space<any>> -> memref<32xf32, #tpu.memory_space<any>>
    %c0_i32_29 = arith.constant 0 : i32
    %87 = tpu.memref_slice %arg8[%c48_i32, %c0_i32_29] : memref<64x32xf32, #tpu.memory_space<vmem>> -> memref<1x32xf32, #tpu.memory_space<vmem>>
    %88 = tpu.memref_squeeze %87 : memref<1x32xf32, #tpu.memory_space<vmem>> -> memref<32xf32, #tpu.memory_space<vmem>>
    %89 = tpu.memref_slice %arg9[%c12_i32] : memref<16x!tpu.dma_semaphore, #tpu.memory_space<semaphore_mem>> -> memref<1x!tpu.dma_semaphore, #tpu.memory_space<semaphore_mem>>
    %90 = tpu.memref_squeeze %89 : memref<1x!tpu.dma_semaphore, #tpu.memory_space<semaphore_mem>> -> memref<!tpu.dma_semaphore, #tpu.memory_space<semaphore_mem>>
    tpu.enqueue_dma source(%86 : memref<32xf32, #tpu.memory_space<any>>) target(%88 : memref<32xf32, #tpu.memory_space<vmem>>) target_semaphore(%90 : memref<!tpu.dma_semaphore, #tpu.memory_space<semaphore_mem>>)
    %c13 = arith.constant 13 : index
    %91 = memref.load %arg0[%c13] : memref<16xi32, #tpu.memory_space<smem>>
    %c49_i32 = arith.constant 49 : i32
    %c13_i32 = arith.constant 13 : i32
    %c0_i32_30 = arith.constant 0 : i32
    %92 = tpu.memref_slice %arg1[%91, %c0_i32_30] : memref<20000x32xf32, #tpu.memory_space<any>> -> memref<1x32xf32, #tpu.memory_space<any>>
    %93 = tpu.memref_squeeze %92 : memref<1x32xf32, #tpu.memory_space<any>> -> memref<32xf32, #tpu.memory_space<any>>
    %c0_i32_31 = arith.constant 0 : i32
    %94 = tpu.memref_slice %arg8[%c49_i32, %c0_i32_31] : memref<64x32xf32, #tpu.memory_space<vmem>> -> memref<1x32xf32, #tpu.memory_space<vmem>>
    %95 = tpu.memref_squeeze %94 : memref<1x32xf32, #tpu.memory_space<vmem>> -> memref<32xf32, #tpu.memory_space<vmem>>
    %96 = tpu.memref_slice %arg9[%c13_i32] : memref<16x!tpu.dma_semaphore, #tpu.memory_space<semaphore_mem>> -> memref<1x!tpu.dma_semaphore, #tpu.memory_space<semaphore_mem>>
    %97 = tpu.memref_squeeze %96 : memref<1x!tpu.dma_semaphore, #tpu.memory_space<semaphore_mem>> -> memref<!tpu.dma_semaphore, #tpu.memory_space<semaphore_mem>>
    tpu.enqueue_dma source(%93 : memref<32xf32, #tpu.memory_space<any>>) target(%95 : memref<32xf32, #tpu.memory_space<vmem>>) target_semaphore(%97 : memref<!tpu.dma_semaphore, #tpu.memory_space<semaphore_mem>>)
    %c14 = arith.constant 14 : index
    %98 = memref.load %arg0[%c14] : memref<16xi32, #tpu.memory_space<smem>>
    %c56_i32 = arith.constant 56 : i32
    %c14_i32 = arith.constant 14 : i32
    %c0_i32_32 = arith.constant 0 : i32
    %99 = tpu.memref_slice %arg1[%98, %c0_i32_32] : memref<20000x32xf32, #tpu.memory_space<any>> -> memref<1x32xf32, #tpu.memory_space<any>>
    %100 = tpu.memref_squeeze %99 : memref<1x32xf32, #tpu.memory_space<any>> -> memref<32xf32, #tpu.memory_space<any>>
    %c0_i32_33 = arith.constant 0 : i32
    %101 = tpu.memref_slice %arg8[%c56_i32, %c0_i32_33] : memref<64x32xf32, #tpu.memory_space<vmem>> -> memref<1x32xf32, #tpu.memory_space<vmem>>
    %102 = tpu.memref_squeeze %101 : memref<1x32xf32, #tpu.memory_space<vmem>> -> memref<32xf32, #tpu.memory_space<vmem>>
    %103 = tpu.memref_slice %arg9[%c14_i32] : memref<16x!tpu.dma_semaphore, #tpu.memory_space<semaphore_mem>> -> memref<1x!tpu.dma_semaphore, #tpu.memory_space<semaphore_mem>>
    %104 = tpu.memref_squeeze %103 : memref<1x!tpu.dma_semaphore, #tpu.memory_space<semaphore_mem>> -> memref<!tpu.dma_semaphore, #tpu.memory_space<semaphore_mem>>
    tpu.enqueue_dma source(%100 : memref<32xf32, #tpu.memory_space<any>>) target(%102 : memref<32xf32, #tpu.memory_space<vmem>>) target_semaphore(%104 : memref<!tpu.dma_semaphore, #tpu.memory_space<semaphore_mem>>)
    %c15 = arith.constant 15 : index
    %105 = memref.load %arg0[%c15] : memref<16xi32, #tpu.memory_space<smem>>
    %c57_i32 = arith.constant 57 : i32
    %c15_i32 = arith.constant 15 : i32
    %c0_i32_34 = arith.constant 0 : i32
    %106 = tpu.memref_slice %arg1[%105, %c0_i32_34] : memref<20000x32xf32, #tpu.memory_space<any>> -> memref<1x32xf32, #tpu.memory_space<any>>
    %107 = tpu.memref_squeeze %106 : memref<1x32xf32, #tpu.memory_space<any>> -> memref<32xf32, #tpu.memory_space<any>>
    %c0_i32_35 = arith.constant 0 : i32
    %108 = tpu.memref_slice %arg8[%c57_i32, %c0_i32_35] : memref<64x32xf32, #tpu.memory_space<vmem>> -> memref<1x32xf32, #tpu.memory_space<vmem>>
    %109 = tpu.memref_squeeze %108 : memref<1x32xf32, #tpu.memory_space<vmem>> -> memref<32xf32, #tpu.memory_space<vmem>>
    %110 = tpu.memref_slice %arg9[%c15_i32] : memref<16x!tpu.dma_semaphore, #tpu.memory_space<semaphore_mem>> -> memref<1x!tpu.dma_semaphore, #tpu.memory_space<semaphore_mem>>
    %111 = tpu.memref_squeeze %110 : memref<1x!tpu.dma_semaphore, #tpu.memory_space<semaphore_mem>> -> memref<!tpu.dma_semaphore, #tpu.memory_space<semaphore_mem>>
    tpu.enqueue_dma source(%107 : memref<32xf32, #tpu.memory_space<any>>) target(%109 : memref<32xf32, #tpu.memory_space<vmem>>) target_semaphore(%111 : memref<!tpu.dma_semaphore, #tpu.memory_space<semaphore_mem>>)
    %112 = tpu.iota {dimensions = array<i32: 1>} : vector<8x128xi32>
    %c64_i32 = arith.constant 64 : i32
    %113 = vector.broadcast %c64_i32 : i32 to vector<8x128xi32>
    %114 = arith.cmpi sge, %112, %113 : vector<8x128xi32>
    %c96_i32 = arith.constant 96 : i32
    %115 = vector.broadcast %c96_i32 : i32 to vector<8x128xi32>
    %116 = arith.cmpi slt, %112, %115 : vector<8x128xi32>
    %117 = arith.andi %114, %116 : vector<8x128xi1>
    %cst = arith.constant 1.000000e+00 : f32
    %cst_36 = arith.constant 5.000000e-01 : f32
    %118 = vector.broadcast %cst : f32 to vector<8x128xf32>
    %119 = vector.broadcast %cst_36 : f32 to vector<8x128xf32>
    %120 = arith.select %117, %118, %119 : vector<8x128xi1>, vector<8x128xf32>
    %cst_37 = arith.constant 0.000000e+00 : f32
    %cst_38 = arith.constant 5.000000e-01 : f32
    %121 = vector.broadcast %cst_37 : f32 to vector<8x128xf32>
    %122 = vector.broadcast %cst_38 : f32 to vector<8x128xf32>
    %123 = arith.select %117, %121, %122 : vector<8x128xi1>, vector<8x128xf32>
    %c0_39 = arith.constant 0 : index
    %c0_40 = arith.constant 0 : index
    %124 = vector.load %arg3[%c0_39, %c0_40] : memref<32x128xf32, #tpu.memory_space<vmem>>, vector<32x128xf32>
    %c0_41 = arith.constant 0 : index
    %c0_42 = arith.constant 0 : index
    %125 = vector.load %arg2[%c0_41, %c0_42] : memref<32x128xf32, #tpu.memory_space<vmem>>, vector<32x128xf32>
    %c0_43 = arith.constant 0 : index
    %c0_44 = arith.constant 0 : index
    %126 = vector.load %arg4[%c0_43, %c0_44] : memref<1x128xf32, #tpu.memory_space<vmem>>, vector<1x128xf32>
    %c0_i32_45 = arith.constant 0 : i32
    %c0_i32_46 = arith.constant 0 : i32
    %c0_i32_47 = arith.constant 0 : i32
    %127 = tpu.memref_slice %arg1[%0, %c0_i32_47] : memref<20000x32xf32, #tpu.memory_space<any>> -> memref<1x32xf32, #tpu.memory_space<any>>
    %128 = tpu.memref_squeeze %127 : memref<1x32xf32, #tpu.memory_space<any>> -> memref<32xf32, #tpu.memory_space<any>>
    %c0_i32_48 = arith.constant 0 : i32
    %129 = tpu.memref_slice %arg8[%c0_i32_45, %c0_i32_48] : memref<64x32xf32, #tpu.memory_space<vmem>> -> memref<1x32xf32, #tpu.memory_space<vmem>>
    %130 = tpu.memref_squeeze %129 : memref<1x32xf32, #tpu.memory_space<vmem>> -> memref<32xf32, #tpu.memory_space<vmem>>
    %131 = tpu.memref_slice %arg9[%c0_i32_46] : memref<16x!tpu.dma_semaphore, #tpu.memory_space<semaphore_mem>> -> memref<1x!tpu.dma_semaphore, #tpu.memory_space<semaphore_mem>>
    %132 = tpu.memref_squeeze %131 : memref<1x!tpu.dma_semaphore, #tpu.memory_space<semaphore_mem>> -> memref<!tpu.dma_semaphore, #tpu.memory_space<semaphore_mem>>
    tpu.wait_dma2 semaphore(%132 : memref<!tpu.dma_semaphore, #tpu.memory_space<semaphore_mem>>) src(%128 : memref<32xf32, #tpu.memory_space<any>>) dst(%130 : memref<32xf32, #tpu.memory_space<vmem>>)
    %c1_i32_49 = arith.constant 1 : i32
    %c1_i32_50 = arith.constant 1 : i32
    %c0_i32_51 = arith.constant 0 : i32
    %133 = tpu.memref_slice %arg1[%7, %c0_i32_51] : memref<20000x32xf32, #tpu.memory_space<any>> -> memref<1x32xf32, #tpu.memory_space<any>>
    %134 = tpu.memref_squeeze %133 : memref<1x32xf32, #tpu.memory_space<any>> -> memref<32xf32, #tpu.memory_space<any>>
    %c0_i32_52 = arith.constant 0 : i32
    %135 = tpu.memref_slice %arg8[%c1_i32_49, %c0_i32_52] : memref<64x32xf32, #tpu.memory_space<vmem>> -> memref<1x32xf32, #tpu.memory_space<vmem>>
    %136 = tpu.memref_squeeze %135 : memref<1x32xf32, #tpu.memory_space<vmem>> -> memref<32xf32, #tpu.memory_space<vmem>>
    %137 = tpu.memref_slice %arg9[%c1_i32_50] : memref<16x!tpu.dma_semaphore, #tpu.memory_space<semaphore_mem>> -> memref<1x!tpu.dma_semaphore, #tpu.memory_space<semaphore_mem>>
    %138 = tpu.memref_squeeze %137 : memref<1x!tpu.dma_semaphore, #tpu.memory_space<semaphore_mem>> -> memref<!tpu.dma_semaphore, #tpu.memory_space<semaphore_mem>>
    tpu.wait_dma2 semaphore(%138 : memref<!tpu.dma_semaphore, #tpu.memory_space<semaphore_mem>>) src(%134 : memref<32xf32, #tpu.memory_space<any>>) dst(%136 : memref<32xf32, #tpu.memory_space<vmem>>)
    %c8_i32_53 = arith.constant 8 : i32
    %c2_i32_54 = arith.constant 2 : i32
    %c0_i32_55 = arith.constant 0 : i32
    %139 = tpu.memref_slice %arg1[%14, %c0_i32_55] : memref<20000x32xf32, #tpu.memory_space<any>> -> memref<1x32xf32, #tpu.memory_space<any>>
    %140 = tpu.memref_squeeze %139 : memref<1x32xf32, #tpu.memory_space<any>> -> memref<32xf32, #tpu.memory_space<any>>
    %c0_i32_56 = arith.constant 0 : i32
    %141 = tpu.memref_slice %arg8[%c8_i32_53, %c0_i32_56] : memref<64x32xf32, #tpu.memory_space<vmem>> -> memref<1x32xf32, #tpu.memory_space<vmem>>
    %142 = tpu.memref_squeeze %141 : memref<1x32xf32, #tpu.memory_space<vmem>> -> memref<32xf32, #tpu.memory_space<vmem>>
    %143 = tpu.memref_slice %arg9[%c2_i32_54] : memref<16x!tpu.dma_semaphore, #tpu.memory_space<semaphore_mem>> -> memref<1x!tpu.dma_semaphore, #tpu.memory_space<semaphore_mem>>
    %144 = tpu.memref_squeeze %143 : memref<1x!tpu.dma_semaphore, #tpu.memory_space<semaphore_mem>> -> memref<!tpu.dma_semaphore, #tpu.memory_space<semaphore_mem>>
    tpu.wait_dma2 semaphore(%144 : memref<!tpu.dma_semaphore, #tpu.memory_space<semaphore_mem>>) src(%140 : memref<32xf32, #tpu.memory_space<any>>) dst(%142 : memref<32xf32, #tpu.memory_space<vmem>>)
    %c9_i32_57 = arith.constant 9 : i32
    %c3_i32_58 = arith.constant 3 : i32
    %c0_i32_59 = arith.constant 0 : i32
    %145 = tpu.memref_slice %arg1[%21, %c0_i32_59] : memref<20000x32xf32, #tpu.memory_space<any>> -> memref<1x32xf32, #tpu.memory_space<any>>
    %146 = tpu.memref_squeeze %145 : memref<1x32xf32, #tpu.memory_space<any>> -> memref<32xf32, #tpu.memory_space<any>>
    %c0_i32_60 = arith.constant 0 : i32
    %147 = tpu.memref_slice %arg8[%c9_i32_57, %c0_i32_60] : memref<64x32xf32, #tpu.memory_space<vmem>> -> memref<1x32xf32, #tpu.memory_space<vmem>>
    %148 = tpu.memref_squeeze %147 : memref<1x32xf32, #tpu.memory_space<vmem>> -> memref<32xf32, #tpu.memory_space<vmem>>
    %149 = tpu.memref_slice %arg9[%c3_i32_58] : memref<16x!tpu.dma_semaphore, #tpu.memory_space<semaphore_mem>> -> memref<1x!tpu.dma_semaphore, #tpu.memory_space<semaphore_mem>>
    %150 = tpu.memref_squeeze %149 : memref<1x!tpu.dma_semaphore, #tpu.memory_space<semaphore_mem>> -> memref<!tpu.dma_semaphore, #tpu.memory_space<semaphore_mem>>
    tpu.wait_dma2 semaphore(%150 : memref<!tpu.dma_semaphore, #tpu.memory_space<semaphore_mem>>) src(%146 : memref<32xf32, #tpu.memory_space<any>>) dst(%148 : memref<32xf32, #tpu.memory_space<vmem>>)
    %c16_i32_61 = arith.constant 16 : i32
    %c4_i32_62 = arith.constant 4 : i32
    %c0_i32_63 = arith.constant 0 : i32
    %151 = tpu.memref_slice %arg1[%28, %c0_i32_63] : memref<20000x32xf32, #tpu.memory_space<any>> -> memref<1x32xf32, #tpu.memory_space<any>>
    %152 = tpu.memref_squeeze %151 : memref<1x32xf32, #tpu.memory_space<any>> -> memref<32xf32, #tpu.memory_space<any>>
    %c0_i32_64 = arith.constant 0 : i32
    %153 = tpu.memref_slice %arg8[%c16_i32_61, %c0_i32_64] : memref<64x32xf32, #tpu.memory_space<vmem>> -> memref<1x32xf32, #tpu.memory_space<vmem>>
    %154 = tpu.memref_squeeze %153 : memref<1x32xf32, #tpu.memory_space<vmem>> -> memref<32xf32, #tpu.memory_space<vmem>>
    %155 = tpu.memref_slice %arg9[%c4_i32_62] : memref<16x!tpu.dma_semaphore, #tpu.memory_space<semaphore_mem>> -> memref<1x!tpu.dma_semaphore, #tpu.memory_space<semaphore_mem>>
    %156 = tpu.memref_squeeze %155 : memref<1x!tpu.dma_semaphore, #tpu.memory_space<semaphore_mem>> -> memref<!tpu.dma_semaphore, #tpu.memory_space<semaphore_mem>>
    tpu.wait_dma2 semaphore(%156 : memref<!tpu.dma_semaphore, #tpu.memory_space<semaphore_mem>>) src(%152 : memref<32xf32, #tpu.memory_space<any>>) dst(%154 : memref<32xf32, #tpu.memory_space<vmem>>)
    %c17_i32_65 = arith.constant 17 : i32
    %c5_i32_66 = arith.constant 5 : i32
    %c0_i32_67 = arith.constant 0 : i32
    %157 = tpu.memref_slice %arg1[%35, %c0_i32_67] : memref<20000x32xf32, #tpu.memory_space<any>> -> memref<1x32xf32, #tpu.memory_space<any>>
    %158 = tpu.memref_squeeze %157 : memref<1x32xf32, #tpu.memory_space<any>> -> memref<32xf32, #tpu.memory_space<any>>
    %c0_i32_68 = arith.constant 0 : i32
    %159 = tpu.memref_slice %arg8[%c17_i32_65, %c0_i32_68] : memref<64x32xf32, #tpu.memory_space<vmem>> -> memref<1x32xf32, #tpu.memory_space<vmem>>
    %160 = tpu.memref_squeeze %159 : memref<1x32xf32, #tpu.memory_space<vmem>> -> memref<32xf32, #tpu.memory_space<vmem>>
    %161 = tpu.memref_slice %arg9[%c5_i32_66] : memref<16x!tpu.dma_semaphore, #tpu.memory_space<semaphore_mem>> -> memref<1x!tpu.dma_semaphore, #tpu.memory_space<semaphore_mem>>
    %162 = tpu.memref_squeeze %161 : memref<1x!tpu.dma_semaphore, #tpu.memory_space<semaphore_mem>> -> memref<!tpu.dma_semaphore, #tpu.memory_space<semaphore_mem>>
    tpu.wait_dma2 semaphore(%162 : memref<!tpu.dma_semaphore, #tpu.memory_space<semaphore_mem>>) src(%158 : memref<32xf32, #tpu.memory_space<any>>) dst(%160 : memref<32xf32, #tpu.memory_space<vmem>>)
    %c24_i32_69 = arith.constant 24 : i32
    %c6_i32_70 = arith.constant 6 : i32
    %c0_i32_71 = arith.constant 0 : i32
    %163 = tpu.memref_slice %arg1[%42, %c0_i32_71] : memref<20000x32xf32, #tpu.memory_space<any>> -> memref<1x32xf32, #tpu.memory_space<any>>
    %164 = tpu.memref_squeeze %163 : memref<1x32xf32, #tpu.memory_space<any>> -> memref<32xf32, #tpu.memory_space<any>>
    %c0_i32_72 = arith.constant 0 : i32
    %165 = tpu.memref_slice %arg8[%c24_i32_69, %c0_i32_72] : memref<64x32xf32, #tpu.memory_space<vmem>> -> memref<1x32xf32, #tpu.memory_space<vmem>>
    %166 = tpu.memref_squeeze %165 : memref<1x32xf32, #tpu.memory_space<vmem>> -> memref<32xf32, #tpu.memory_space<vmem>>
    %167 = tpu.memref_slice %arg9[%c6_i32_70] : memref<16x!tpu.dma_semaphore, #tpu.memory_space<semaphore_mem>> -> memref<1x!tpu.dma_semaphore, #tpu.memory_space<semaphore_mem>>
    %168 = tpu.memref_squeeze %167 : memref<1x!tpu.dma_semaphore, #tpu.memory_space<semaphore_mem>> -> memref<!tpu.dma_semaphore, #tpu.memory_space<semaphore_mem>>
    tpu.wait_dma2 semaphore(%168 : memref<!tpu.dma_semaphore, #tpu.memory_space<semaphore_mem>>) src(%164 : memref<32xf32, #tpu.memory_space<any>>) dst(%166 : memref<32xf32, #tpu.memory_space<vmem>>)
    %c25_i32_73 = arith.constant 25 : i32
    %c7_i32_74 = arith.constant 7 : i32
    %c0_i32_75 = arith.constant 0 : i32
    %169 = tpu.memref_slice %arg1[%49, %c0_i32_75] : memref<20000x32xf32, #tpu.memory_space<any>> -> memref<1x32xf32, #tpu.memory_space<any>>
    %170 = tpu.memref_squeeze %169 : memref<1x32xf32, #tpu.memory_space<any>> -> memref<32xf32, #tpu.memory_space<any>>
    %c0_i32_76 = arith.constant 0 : i32
    %171 = tpu.memref_slice %arg8[%c25_i32_73, %c0_i32_76] : memref<64x32xf32, #tpu.memory_space<vmem>> -> memref<1x32xf32, #tpu.memory_space<vmem>>
    %172 = tpu.memref_squeeze %171 : memref<1x32xf32, #tpu.memory_space<vmem>> -> memref<32xf32, #tpu.memory_space<vmem>>
    %173 = tpu.memref_slice %arg9[%c7_i32_74] : memref<16x!tpu.dma_semaphore, #tpu.memory_space<semaphore_mem>> -> memref<1x!tpu.dma_semaphore, #tpu.memory_space<semaphore_mem>>
    %174 = tpu.memref_squeeze %173 : memref<1x!tpu.dma_semaphore, #tpu.memory_space<semaphore_mem>> -> memref<!tpu.dma_semaphore, #tpu.memory_space<semaphore_mem>>
    tpu.wait_dma2 semaphore(%174 : memref<!tpu.dma_semaphore, #tpu.memory_space<semaphore_mem>>) src(%170 : memref<32xf32, #tpu.memory_space<any>>) dst(%172 : memref<32xf32, #tpu.memory_space<vmem>>)
    %c32_i32_77 = arith.constant 32 : i32
    %c8_i32_78 = arith.constant 8 : i32
    %c0_i32_79 = arith.constant 0 : i32
    %175 = tpu.memref_slice %arg1[%56, %c0_i32_79] : memref<20000x32xf32, #tpu.memory_space<any>> -> memref<1x32xf32, #tpu.memory_space<any>>
    %176 = tpu.memref_squeeze %175 : memref<1x32xf32, #tpu.memory_space<any>> -> memref<32xf32, #tpu.memory_space<any>>
    %c0_i32_80 = arith.constant 0 : i32
    %177 = tpu.memref_slice %arg8[%c32_i32_77, %c0_i32_80] : memref<64x32xf32, #tpu.memory_space<vmem>> -> memref<1x32xf32, #tpu.memory_space<vmem>>
    %178 = tpu.memref_squeeze %177 : memref<1x32xf32, #tpu.memory_space<vmem>> -> memref<32xf32, #tpu.memory_space<vmem>>
    %179 = tpu.memref_slice %arg9[%c8_i32_78] : memref<16x!tpu.dma_semaphore, #tpu.memory_space<semaphore_mem>> -> memref<1x!tpu.dma_semaphore, #tpu.memory_space<semaphore_mem>>
    %180 = tpu.memref_squeeze %179 : memref<1x!tpu.dma_semaphore, #tpu.memory_space<semaphore_mem>> -> memref<!tpu.dma_semaphore, #tpu.memory_space<semaphore_mem>>
    tpu.wait_dma2 semaphore(%180 : memref<!tpu.dma_semaphore, #tpu.memory_space<semaphore_mem>>) src(%176 : memref<32xf32, #tpu.memory_space<any>>) dst(%178 : memref<32xf32, #tpu.memory_space<vmem>>)
    %c33_i32_81 = arith.constant 33 : i32
    %c9_i32_82 = arith.constant 9 : i32
    %c0_i32_83 = arith.constant 0 : i32
    %181 = tpu.memref_slice %arg1[%63, %c0_i32_83] : memref<20000x32xf32, #tpu.memory_space<any>> -> memref<1x32xf32, #tpu.memory_space<any>>
    %182 = tpu.memref_squeeze %181 : memref<1x32xf32, #tpu.memory_space<any>> -> memref<32xf32, #tpu.memory_space<any>>
    %c0_i32_84 = arith.constant 0 : i32
    %183 = tpu.memref_slice %arg8[%c33_i32_81, %c0_i32_84] : memref<64x32xf32, #tpu.memory_space<vmem>> -> memref<1x32xf32, #tpu.memory_space<vmem>>
    %184 = tpu.memref_squeeze %183 : memref<1x32xf32, #tpu.memory_space<vmem>> -> memref<32xf32, #tpu.memory_space<vmem>>
    %185 = tpu.memref_slice %arg9[%c9_i32_82] : memref<16x!tpu.dma_semaphore, #tpu.memory_space<semaphore_mem>> -> memref<1x!tpu.dma_semaphore, #tpu.memory_space<semaphore_mem>>
    %186 = tpu.memref_squeeze %185 : memref<1x!tpu.dma_semaphore, #tpu.memory_space<semaphore_mem>> -> memref<!tpu.dma_semaphore, #tpu.memory_space<semaphore_mem>>
    tpu.wait_dma2 semaphore(%186 : memref<!tpu.dma_semaphore, #tpu.memory_space<semaphore_mem>>) src(%182 : memref<32xf32, #tpu.memory_space<any>>) dst(%184 : memref<32xf32, #tpu.memory_space<vmem>>)
    %c40_i32_85 = arith.constant 40 : i32
    %c10_i32_86 = arith.constant 10 : i32
    %c0_i32_87 = arith.constant 0 : i32
    %187 = tpu.memref_slice %arg1[%70, %c0_i32_87] : memref<20000x32xf32, #tpu.memory_space<any>> -> memref<1x32xf32, #tpu.memory_space<any>>
    %188 = tpu.memref_squeeze %187 : memref<1x32xf32, #tpu.memory_space<any>> -> memref<32xf32, #tpu.memory_space<any>>
    %c0_i32_88 = arith.constant 0 : i32
    %189 = tpu.memref_slice %arg8[%c40_i32_85, %c0_i32_88] : memref<64x32xf32, #tpu.memory_space<vmem>> -> memref<1x32xf32, #tpu.memory_space<vmem>>
    %190 = tpu.memref_squeeze %189 : memref<1x32xf32, #tpu.memory_space<vmem>> -> memref<32xf32, #tpu.memory_space<vmem>>
    %191 = tpu.memref_slice %arg9[%c10_i32_86] : memref<16x!tpu.dma_semaphore, #tpu.memory_space<semaphore_mem>> -> memref<1x!tpu.dma_semaphore, #tpu.memory_space<semaphore_mem>>
    %192 = tpu.memref_squeeze %191 : memref<1x!tpu.dma_semaphore, #tpu.memory_space<semaphore_mem>> -> memref<!tpu.dma_semaphore, #tpu.memory_space<semaphore_mem>>
    tpu.wait_dma2 semaphore(%192 : memref<!tpu.dma_semaphore, #tpu.memory_space<semaphore_mem>>) src(%188 : memref<32xf32, #tpu.memory_space<any>>) dst(%190 : memref<32xf32, #tpu.memory_space<vmem>>)
    %c41_i32_89 = arith.constant 41 : i32
    %c11_i32_90 = arith.constant 11 : i32
    %c0_i32_91 = arith.constant 0 : i32
    %193 = tpu.memref_slice %arg1[%77, %c0_i32_91] : memref<20000x32xf32, #tpu.memory_space<any>> -> memref<1x32xf32, #tpu.memory_space<any>>
    %194 = tpu.memref_squeeze %193 : memref<1x32xf32, #tpu.memory_space<any>> -> memref<32xf32, #tpu.memory_space<any>>
    %c0_i32_92 = arith.constant 0 : i32
    %195 = tpu.memref_slice %arg8[%c41_i32_89, %c0_i32_92] : memref<64x32xf32, #tpu.memory_space<vmem>> -> memref<1x32xf32, #tpu.memory_space<vmem>>
    %196 = tpu.memref_squeeze %195 : memref<1x32xf32, #tpu.memory_space<vmem>> -> memref<32xf32, #tpu.memory_space<vmem>>
    %197 = tpu.memref_slice %arg9[%c11_i32_90] : memref<16x!tpu.dma_semaphore, #tpu.memory_space<semaphore_mem>> -> memref<1x!tpu.dma_semaphore, #tpu.memory_space<semaphore_mem>>
    %198 = tpu.memref_squeeze %197 : memref<1x!tpu.dma_semaphore, #tpu.memory_space<semaphore_mem>> -> memref<!tpu.dma_semaphore, #tpu.memory_space<semaphore_mem>>
    tpu.wait_dma2 semaphore(%198 : memref<!tpu.dma_semaphore, #tpu.memory_space<semaphore_mem>>) src(%194 : memref<32xf32, #tpu.memory_space<any>>) dst(%196 : memref<32xf32, #tpu.memory_space<vmem>>)
    %c48_i32_93 = arith.constant 48 : i32
    %c12_i32_94 = arith.constant 12 : i32
    %c0_i32_95 = arith.constant 0 : i32
    %199 = tpu.memref_slice %arg1[%84, %c0_i32_95] : memref<20000x32xf32, #tpu.memory_space<any>> -> memref<1x32xf32, #tpu.memory_space<any>>
    %200 = tpu.memref_squeeze %199 : memref<1x32xf32, #tpu.memory_space<any>> -> memref<32xf32, #tpu.memory_space<any>>
    %c0_i32_96 = arith.constant 0 : i32
    %201 = tpu.memref_slice %arg8[%c48_i32_93, %c0_i32_96] : memref<64x32xf32, #tpu.memory_space<vmem>> -> memref<1x32xf32, #tpu.memory_space<vmem>>
    %202 = tpu.memref_squeeze %201 : memref<1x32xf32, #tpu.memory_space<vmem>> -> memref<32xf32, #tpu.memory_space<vmem>>
    %203 = tpu.memref_slice %arg9[%c12_i32_94] : memref<16x!tpu.dma_semaphore, #tpu.memory_space<semaphore_mem>> -> memref<1x!tpu.dma_semaphore, #tpu.memory_space<semaphore_mem>>
    %204 = tpu.memref_squeeze %203 : memref<1x!tpu.dma_semaphore, #tpu.memory_space<semaphore_mem>> -> memref<!tpu.dma_semaphore, #tpu.memory_space<semaphore_mem>>
    tpu.wait_dma2 semaphore(%204 : memref<!tpu.dma_semaphore, #tpu.memory_space<semaphore_mem>>) src(%200 : memref<32xf32, #tpu.memory_space<any>>) dst(%202 : memref<32xf32, #tpu.memory_space<vmem>>)
    %c49_i32_97 = arith.constant 49 : i32
    %c13_i32_98 = arith.constant 13 : i32
    %c0_i32_99 = arith.constant 0 : i32
    %205 = tpu.memref_slice %arg1[%91, %c0_i32_99] : memref<20000x32xf32, #tpu.memory_space<any>> -> memref<1x32xf32, #tpu.memory_space<any>>
    %206 = tpu.memref_squeeze %205 : memref<1x32xf32, #tpu.memory_space<any>> -> memref<32xf32, #tpu.memory_space<any>>
    %c0_i32_100 = arith.constant 0 : i32
    %207 = tpu.memref_slice %arg8[%c49_i32_97, %c0_i32_100] : memref<64x32xf32, #tpu.memory_space<vmem>> -> memref<1x32xf32, #tpu.memory_space<vmem>>
    %208 = tpu.memref_squeeze %207 : memref<1x32xf32, #tpu.memory_space<vmem>> -> memref<32xf32, #tpu.memory_space<vmem>>
    %209 = tpu.memref_slice %arg9[%c13_i32_98] : memref<16x!tpu.dma_semaphore, #tpu.memory_space<semaphore_mem>> -> memref<1x!tpu.dma_semaphore, #tpu.memory_space<semaphore_mem>>
    %210 = tpu.memref_squeeze %209 : memref<1x!tpu.dma_semaphore, #tpu.memory_space<semaphore_mem>> -> memref<!tpu.dma_semaphore, #tpu.memory_space<semaphore_mem>>
    tpu.wait_dma2 semaphore(%210 : memref<!tpu.dma_semaphore, #tpu.memory_space<semaphore_mem>>) src(%206 : memref<32xf32, #tpu.memory_space<any>>) dst(%208 : memref<32xf32, #tpu.memory_space<vmem>>)
    %c56_i32_101 = arith.constant 56 : i32
    %c14_i32_102 = arith.constant 14 : i32
    %c0_i32_103 = arith.constant 0 : i32
    %211 = tpu.memref_slice %arg1[%98, %c0_i32_103] : memref<20000x32xf32, #tpu.memory_space<any>> -> memref<1x32xf32, #tpu.memory_space<any>>
    %212 = tpu.memref_squeeze %211 : memref<1x32xf32, #tpu.memory_space<any>> -> memref<32xf32, #tpu.memory_space<any>>
    %c0_i32_104 = arith.constant 0 : i32
    %213 = tpu.memref_slice %arg8[%c56_i32_101, %c0_i32_104] : memref<64x32xf32, #tpu.memory_space<vmem>> -> memref<1x32xf32, #tpu.memory_space<vmem>>
    %214 = tpu.memref_squeeze %213 : memref<1x32xf32, #tpu.memory_space<vmem>> -> memref<32xf32, #tpu.memory_space<vmem>>
    %215 = tpu.memref_slice %arg9[%c14_i32_102] : memref<16x!tpu.dma_semaphore, #tpu.memory_space<semaphore_mem>> -> memref<1x!tpu.dma_semaphore, #tpu.memory_space<semaphore_mem>>
    %216 = tpu.memref_squeeze %215 : memref<1x!tpu.dma_semaphore, #tpu.memory_space<semaphore_mem>> -> memref<!tpu.dma_semaphore, #tpu.memory_space<semaphore_mem>>
    tpu.wait_dma2 semaphore(%216 : memref<!tpu.dma_semaphore, #tpu.memory_space<semaphore_mem>>) src(%212 : memref<32xf32, #tpu.memory_space<any>>) dst(%214 : memref<32xf32, #tpu.memory_space<vmem>>)
    %c57_i32_105 = arith.constant 57 : i32
    %c15_i32_106 = arith.constant 15 : i32
    %c0_i32_107 = arith.constant 0 : i32
    %217 = tpu.memref_slice %arg1[%105, %c0_i32_107] : memref<20000x32xf32, #tpu.memory_space<any>> -> memref<1x32xf32, #tpu.memory_space<any>>
    %218 = tpu.memref_squeeze %217 : memref<1x32xf32, #tpu.memory_space<any>> -> memref<32xf32, #tpu.memory_space<any>>
    %c0_i32_108 = arith.constant 0 : i32
    %219 = tpu.memref_slice %arg8[%c57_i32_105, %c0_i32_108] : memref<64x32xf32, #tpu.memory_space<vmem>> -> memref<1x32xf32, #tpu.memory_space<vmem>>
    %220 = tpu.memref_squeeze %219 : memref<1x32xf32, #tpu.memory_space<vmem>> -> memref<32xf32, #tpu.memory_space<vmem>>
    %221 = tpu.memref_slice %arg9[%c15_i32_106] : memref<16x!tpu.dma_semaphore, #tpu.memory_space<semaphore_mem>> -> memref<1x!tpu.dma_semaphore, #tpu.memory_space<semaphore_mem>>
    %222 = tpu.memref_squeeze %221 : memref<1x!tpu.dma_semaphore, #tpu.memory_space<semaphore_mem>> -> memref<!tpu.dma_semaphore, #tpu.memory_space<semaphore_mem>>
    tpu.wait_dma2 semaphore(%222 : memref<!tpu.dma_semaphore, #tpu.memory_space<semaphore_mem>>) src(%218 : memref<32xf32, #tpu.memory_space<any>>) dst(%220 : memref<32xf32, #tpu.memory_space<vmem>>)
    %c0_109 = arith.constant 0 : index
    %c0_110 = arith.constant 0 : index
    %223 = vector.load %arg8[%c0_109, %c0_110] : memref<64x32xf32, #tpu.memory_space<vmem>>, vector<64x32xf32>
    %224 = tpu.iota {dimensions = array<i32: 0>} : vector<64x32xi32>
    %c8_i32_111 = arith.constant 8 : i32
    %c0_i32_112 = arith.constant 0 : i32
    %225 = arith.cmpi eq, %c8_i32_111, %c0_i32_112 : i32
    %c1_i32_113 = arith.constant 1 : i32
    %226 = arith.select %225, %c1_i32_113, %c8_i32_111 : i32
    %227 = vector.broadcast %226 : i32 to vector<64x32xi32>
    %228 = arith.remsi %224, %227 : vector<64x32xi32>
    %c0_i32_114 = arith.constant 0 : i32
    %229 = vector.broadcast %c0_i32_114 : i32 to vector<64x32xi32>
    %230 = arith.cmpi ne, %228, %229 : vector<64x32xi32>
    %c0_i32_115 = arith.constant 0 : i32
    %231 = vector.broadcast %c0_i32_115 : i32 to vector<64x32xi32>
    %232 = arith.cmpi slt, %228, %231 : vector<64x32xi32>
    %c0_i32_116 = arith.constant 0 : i32
    %233 = arith.cmpi slt, %226, %c0_i32_116 : i32
    %234 = vector.broadcast %233 : i1 to vector<64x32xi1>
    %235 = vector.broadcast %234 : vector<64x32xi1> to vector<64x32xi1>
    %236 = arith.xori %232, %235 : vector<64x32xi1>
    %237 = arith.andi %236, %230 : vector<64x32xi1>
    %238 = vector.broadcast %226 : i32 to vector<64x32xi32>
    %239 = arith.addi %228, %238 : vector<64x32xi32>
    %240 = arith.select %237, %239, %228 : vector<64x32xi1>, vector<64x32xi32>
    %c2_i32_117 = arith.constant 2 : i32
    %241 = vector.broadcast %c2_i32_117 : i32 to vector<64x32xi32>
    %242 = arith.cmpi slt, %240, %241 : vector<64x32xi32>
    %cst_118 = arith.constant 0.000000e+00 : f32
    %243 = vector.broadcast %cst_118 : f32 to vector<64x32xf32>
    %244 = arith.select %242, %223, %243 : vector<64x32xi1>, vector<64x32xf32>
    %cst_119 = arith.constant dense<0.000000e+00> : vector<64x128xf32>
    %245 = tpu.matmul %244, %125, %cst_119 {dimension_numbers = #tpu.dot_dimension_numbers<[1], [0], [0], [1], [0, 0, 1, 1], [], []>} : vector<64x32xf32>, vector<32x128xf32>, vector<64x128xf32> -> vector<64x128xf32>
    %246 = vector.broadcast %126 : vector<1x128xf32> to vector<64x128xf32>
    %247 = arith.addf %245, %246 : vector<64x128xf32>
    %cst_120 = arith.constant 0.000000e+00 : f32
    %248 = vector.broadcast %cst_120 : f32 to vector<8x32xf32>
    %cst_121 = arith.constant 0.000000e+00 : f32
    %249 = vector.broadcast %cst_121 : f32 to vector<8x32xf32>
    %250 = vector.extract_strided_slice %247 {offsets = [0, 0], sizes = [8, 128], strides = [1, 1]} : vector<64x128xf32> to vector<8x128xf32>
    %cst_122 = arith.constant dense<0.000000e+00> : vector<8x128xf32>
    %251 = tpu.matmul %248, %124, %cst_122 {dimension_numbers = #tpu.dot_dimension_numbers<[1], [0], [0], [1], [0, 0, 1, 1], [], []>} : vector<8x32xf32>, vector<32x128xf32>, vector<8x128xf32> -> vector<8x128xf32>
    %252 = arith.addf %250, %251 : vector<8x128xf32>
    %253 = arith.mulf %252, %120 : vector<8x128xf32>
    %254 = math.tanh %253 : vector<8x128xf32>
    %255 = arith.mulf %120, %254 : vector<8x128xf32>
    %256 = arith.addf %255, %123 : vector<8x128xf32>
    %257 = vector.extract_strided_slice %256 {offsets = [0, 0], sizes = [8, 32], strides = [1, 1]} : vector<8x128xf32> to vector<8x32xf32>
    %258 = vector.extract_strided_slice %256 {offsets = [0, 32], sizes = [8, 32], strides = [1, 1]} : vector<8x128xf32> to vector<8x32xf32>
    %259 = vector.extract_strided_slice %256 {offsets = [0, 64], sizes = [8, 32], strides = [1, 1]} : vector<8x128xf32> to vector<8x32xf32>
    %260 = vector.extract_strided_slice %256 {offsets = [0, 96], sizes = [8, 32], strides = [1, 1]} : vector<8x128xf32> to vector<8x32xf32>
    %261 = arith.mulf %258, %249 : vector<8x32xf32>
    %262 = arith.mulf %257, %259 : vector<8x32xf32>
    %263 = arith.addf %261, %262 : vector<8x32xf32>
    %264 = math.tanh %263 : vector<8x32xf32>
    %265 = arith.mulf %260, %264 : vector<8x32xf32>
    %266 = vector.extract_strided_slice %247 {offsets = [8, 0], sizes = [8, 128], strides = [1, 1]} : vector<64x128xf32> to vector<8x128xf32>
    %cst_123 = arith.constant dense<0.000000e+00> : vector<8x128xf32>
    %267 = tpu.matmul %265, %124, %cst_123 {dimension_numbers = #tpu.dot_dimension_numbers<[1], [0], [0], [1], [0, 0, 1, 1], [], []>} : vector<8x32xf32>, vector<32x128xf32>, vector<8x128xf32> -> vector<8x128xf32>
    %268 = arith.addf %266, %267 : vector<8x128xf32>
    %269 = arith.mulf %268, %120 : vector<8x128xf32>
    %270 = math.tanh %269 : vector<8x128xf32>
    %271 = arith.mulf %120, %270 : vector<8x128xf32>
    %272 = arith.addf %271, %123 : vector<8x128xf32>
    %273 = vector.extract_strided_slice %272 {offsets = [0, 0], sizes = [8, 32], strides = [1, 1]} : vector<8x128xf32> to vector<8x32xf32>
    %274 = vector.extract_strided_slice %272 {offsets = [0, 32], sizes = [8, 32], strides = [1, 1]} : vector<8x128xf32> to vector<8x32xf32>
    %275 = vector.extract_strided_slice %272 {offsets = [0, 64], sizes = [8, 32], strides = [1, 1]} : vector<8x128xf32> to vector<8x32xf32>
    %276 = vector.extract_strided_slice %272 {offsets = [0, 96], sizes = [8, 32], strides = [1, 1]} : vector<8x128xf32> to vector<8x32xf32>
    %277 = arith.mulf %274, %263 : vector<8x32xf32>
    %278 = arith.mulf %273, %275 : vector<8x32xf32>
    %279 = arith.addf %277, %278 : vector<8x32xf32>
    %280 = math.tanh %279 : vector<8x32xf32>
    %281 = arith.mulf %276, %280 : vector<8x32xf32>
    %282 = vector.extract_strided_slice %247 {offsets = [16, 0], sizes = [8, 128], strides = [1, 1]} : vector<64x128xf32> to vector<8x128xf32>
    %cst_124 = arith.constant dense<0.000000e+00> : vector<8x128xf32>
    %283 = tpu.matmul %281, %124, %cst_124 {dimension_numbers = #tpu.dot_dimension_numbers<[1], [0], [0], [1], [0, 0, 1, 1], [], []>} : vector<8x32xf32>, vector<32x128xf32>, vector<8x128xf32> -> vector<8x128xf32>
    %284 = arith.addf %282, %283 : vector<8x128xf32>
    %285 = arith.mulf %284, %120 : vector<8x128xf32>
    %286 = math.tanh %285 : vector<8x128xf32>
    %287 = arith.mulf %120, %286 : vector<8x128xf32>
    %288 = arith.addf %287, %123 : vector<8x128xf32>
    %289 = vector.extract_strided_slice %288 {offsets = [0, 0], sizes = [8, 32], strides = [1, 1]} : vector<8x128xf32> to vector<8x32xf32>
    %290 = vector.extract_strided_slice %288 {offsets = [0, 32], sizes = [8, 32], strides = [1, 1]} : vector<8x128xf32> to vector<8x32xf32>
    %291 = vector.extract_strided_slice %288 {offsets = [0, 64], sizes = [8, 32], strides = [1, 1]} : vector<8x128xf32> to vector<8x32xf32>
    %292 = vector.extract_strided_slice %288 {offsets = [0, 96], sizes = [8, 32], strides = [1, 1]} : vector<8x128xf32> to vector<8x32xf32>
    %293 = arith.mulf %290, %279 : vector<8x32xf32>
    %294 = arith.mulf %289, %291 : vector<8x32xf32>
    %295 = arith.addf %293, %294 : vector<8x32xf32>
    %296 = math.tanh %295 : vector<8x32xf32>
    %297 = arith.mulf %292, %296 : vector<8x32xf32>
    %298 = vector.extract_strided_slice %247 {offsets = [24, 0], sizes = [8, 128], strides = [1, 1]} : vector<64x128xf32> to vector<8x128xf32>
    %cst_125 = arith.constant dense<0.000000e+00> : vector<8x128xf32>
    %299 = tpu.matmul %297, %124, %cst_125 {dimension_numbers = #tpu.dot_dimension_numbers<[1], [0], [0], [1], [0, 0, 1, 1], [], []>} : vector<8x32xf32>, vector<32x128xf32>, vector<8x128xf32> -> vector<8x128xf32>
    %300 = arith.addf %298, %299 : vector<8x128xf32>
    %301 = arith.mulf %300, %120 : vector<8x128xf32>
    %302 = math.tanh %301 : vector<8x128xf32>
    %303 = arith.mulf %120, %302 : vector<8x128xf32>
    %304 = arith.addf %303, %123 : vector<8x128xf32>
    %305 = vector.extract_strided_slice %304 {offsets = [0, 0], sizes = [8, 32], strides = [1, 1]} : vector<8x128xf32> to vector<8x32xf32>
    %306 = vector.extract_strided_slice %304 {offsets = [0, 32], sizes = [8, 32], strides = [1, 1]} : vector<8x128xf32> to vector<8x32xf32>
    %307 = vector.extract_strided_slice %304 {offsets = [0, 64], sizes = [8, 32], strides = [1, 1]} : vector<8x128xf32> to vector<8x32xf32>
    %308 = vector.extract_strided_slice %304 {offsets = [0, 96], sizes = [8, 32], strides = [1, 1]} : vector<8x128xf32> to vector<8x32xf32>
    %309 = arith.mulf %306, %295 : vector<8x32xf32>
    %310 = arith.mulf %305, %307 : vector<8x32xf32>
    %311 = arith.addf %309, %310 : vector<8x32xf32>
    %312 = math.tanh %311 : vector<8x32xf32>
    %313 = arith.mulf %308, %312 : vector<8x32xf32>
    %314 = vector.extract_strided_slice %247 {offsets = [32, 0], sizes = [8, 128], strides = [1, 1]} : vector<64x128xf32> to vector<8x128xf32>
    %cst_126 = arith.constant dense<0.000000e+00> : vector<8x128xf32>
    %315 = tpu.matmul %313, %124, %cst_126 {dimension_numbers = #tpu.dot_dimension_numbers<[1], [0], [0], [1], [0, 0, 1, 1], [], []>} : vector<8x32xf32>, vector<32x128xf32>, vector<8x128xf32> -> vector<8x128xf32>
    %316 = arith.addf %314, %315 : vector<8x128xf32>
    %317 = arith.mulf %316, %120 : vector<8x128xf32>
    %318 = math.tanh %317 : vector<8x128xf32>
    %319 = arith.mulf %120, %318 : vector<8x128xf32>
    %320 = arith.addf %319, %123 : vector<8x128xf32>
    %321 = vector.extract_strided_slice %320 {offsets = [0, 0], sizes = [8, 32], strides = [1, 1]} : vector<8x128xf32> to vector<8x32xf32>
    %322 = vector.extract_strided_slice %320 {offsets = [0, 32], sizes = [8, 32], strides = [1, 1]} : vector<8x128xf32> to vector<8x32xf32>
    %323 = vector.extract_strided_slice %320 {offsets = [0, 64], sizes = [8, 32], strides = [1, 1]} : vector<8x128xf32> to vector<8x32xf32>
    %324 = vector.extract_strided_slice %320 {offsets = [0, 96], sizes = [8, 32], strides = [1, 1]} : vector<8x128xf32> to vector<8x32xf32>
    %325 = arith.mulf %322, %311 : vector<8x32xf32>
    %326 = arith.mulf %321, %323 : vector<8x32xf32>
    %327 = arith.addf %325, %326 : vector<8x32xf32>
    %328 = math.tanh %327 : vector<8x32xf32>
    %329 = arith.mulf %324, %328 : vector<8x32xf32>
    %330 = vector.extract_strided_slice %247 {offsets = [40, 0], sizes = [8, 128], strides = [1, 1]} : vector<64x128xf32> to vector<8x128xf32>
    %cst_127 = arith.constant dense<0.000000e+00> : vector<8x128xf32>
    %331 = tpu.matmul %329, %124, %cst_127 {dimension_numbers = #tpu.dot_dimension_numbers<[1], [0], [0], [1], [0, 0, 1, 1], [], []>} : vector<8x32xf32>, vector<32x128xf32>, vector<8x128xf32> -> vector<8x128xf32>
    %332 = arith.addf %330, %331 : vector<8x128xf32>
    %333 = arith.mulf %332, %120 : vector<8x128xf32>
    %334 = math.tanh %333 : vector<8x128xf32>
    %335 = arith.mulf %120, %334 : vector<8x128xf32>
    %336 = arith.addf %335, %123 : vector<8x128xf32>
    %337 = vector.extract_strided_slice %336 {offsets = [0, 0], sizes = [8, 32], strides = [1, 1]} : vector<8x128xf32> to vector<8x32xf32>
    %338 = vector.extract_strided_slice %336 {offsets = [0, 32], sizes = [8, 32], strides = [1, 1]} : vector<8x128xf32> to vector<8x32xf32>
    %339 = vector.extract_strided_slice %336 {offsets = [0, 64], sizes = [8, 32], strides = [1, 1]} : vector<8x128xf32> to vector<8x32xf32>
    %340 = vector.extract_strided_slice %336 {offsets = [0, 96], sizes = [8, 32], strides = [1, 1]} : vector<8x128xf32> to vector<8x32xf32>
    %341 = arith.mulf %338, %327 : vector<8x32xf32>
    %342 = arith.mulf %337, %339 : vector<8x32xf32>
    %343 = arith.addf %341, %342 : vector<8x32xf32>
    %344 = math.tanh %343 : vector<8x32xf32>
    %345 = arith.mulf %340, %344 : vector<8x32xf32>
    %346 = vector.extract_strided_slice %247 {offsets = [48, 0], sizes = [8, 128], strides = [1, 1]} : vector<64x128xf32> to vector<8x128xf32>
    %cst_128 = arith.constant dense<0.000000e+00> : vector<8x128xf32>
    %347 = tpu.matmul %345, %124, %cst_128 {dimension_numbers = #tpu.dot_dimension_numbers<[1], [0], [0], [1], [0, 0, 1, 1], [], []>} : vector<8x32xf32>, vector<32x128xf32>, vector<8x128xf32> -> vector<8x128xf32>
    %348 = arith.addf %346, %347 : vector<8x128xf32>
    %349 = arith.mulf %348, %120 : vector<8x128xf32>
    %350 = math.tanh %349 : vector<8x128xf32>
    %351 = arith.mulf %120, %350 : vector<8x128xf32>
    %352 = arith.addf %351, %123 : vector<8x128xf32>
    %353 = vector.extract_strided_slice %352 {offsets = [0, 0], sizes = [8, 32], strides = [1, 1]} : vector<8x128xf32> to vector<8x32xf32>
    %354 = vector.extract_strided_slice %352 {offsets = [0, 32], sizes = [8, 32], strides = [1, 1]} : vector<8x128xf32> to vector<8x32xf32>
    %355 = vector.extract_strided_slice %352 {offsets = [0, 64], sizes = [8, 32], strides = [1, 1]} : vector<8x128xf32> to vector<8x32xf32>
    %356 = vector.extract_strided_slice %352 {offsets = [0, 96], sizes = [8, 32], strides = [1, 1]} : vector<8x128xf32> to vector<8x32xf32>
    %357 = arith.mulf %354, %343 : vector<8x32xf32>
    %358 = arith.mulf %353, %355 : vector<8x32xf32>
    %359 = arith.addf %357, %358 : vector<8x32xf32>
    %360 = math.tanh %359 : vector<8x32xf32>
    %361 = arith.mulf %356, %360 : vector<8x32xf32>
    %362 = vector.extract_strided_slice %247 {offsets = [56, 0], sizes = [8, 128], strides = [1, 1]} : vector<64x128xf32> to vector<8x128xf32>
    %cst_129 = arith.constant dense<0.000000e+00> : vector<8x128xf32>
    %363 = tpu.matmul %361, %124, %cst_129 {dimension_numbers = #tpu.dot_dimension_numbers<[1], [0], [0], [1], [0, 0, 1, 1], [], []>} : vector<8x32xf32>, vector<32x128xf32>, vector<8x128xf32> -> vector<8x128xf32>
    %364 = arith.addf %362, %363 : vector<8x128xf32>
    %365 = arith.mulf %364, %120 : vector<8x128xf32>
    %366 = math.tanh %365 : vector<8x128xf32>
    %367 = arith.mulf %120, %366 : vector<8x128xf32>
    %368 = arith.addf %367, %123 : vector<8x128xf32>
    %369 = vector.extract_strided_slice %368 {offsets = [0, 0], sizes = [8, 32], strides = [1, 1]} : vector<8x128xf32> to vector<8x32xf32>
    %370 = vector.extract_strided_slice %368 {offsets = [0, 32], sizes = [8, 32], strides = [1, 1]} : vector<8x128xf32> to vector<8x32xf32>
    %371 = vector.extract_strided_slice %368 {offsets = [0, 64], sizes = [8, 32], strides = [1, 1]} : vector<8x128xf32> to vector<8x32xf32>
    %372 = vector.extract_strided_slice %368 {offsets = [0, 96], sizes = [8, 32], strides = [1, 1]} : vector<8x128xf32> to vector<8x32xf32>
    %373 = arith.mulf %370, %359 : vector<8x32xf32>
    %374 = arith.mulf %369, %371 : vector<8x32xf32>
    %375 = arith.addf %373, %374 : vector<8x32xf32>
    %376 = math.tanh %375 : vector<8x32xf32>
    %377 = arith.mulf %372, %376 : vector<8x32xf32>
    %c0_130 = arith.constant 0 : index
    %c0_131 = arith.constant 0 : index
    %378 = vector.load %arg5[%c0_130, %c0_131] : memref<32x128xf32, #tpu.memory_space<vmem>>, vector<32x128xf32>
    %cst_132 = arith.constant dense<0.000000e+00> : vector<8x128xf32>
    %379 = tpu.matmul %377, %378, %cst_132 {dimension_numbers = #tpu.dot_dimension_numbers<[1], [0], [0], [1], [0, 0, 1, 1], [], []>} : vector<8x32xf32>, vector<32x128xf32>, vector<8x128xf32> -> vector<8x128xf32>
    %c0_133 = arith.constant 0 : index
    %c0_134 = arith.constant 0 : index
    %380 = vector.load %arg6[%c0_133, %c0_134] : memref<1x128xf32, #tpu.memory_space<vmem>>, vector<1x128xf32>
    %381 = vector.broadcast %380 : vector<1x128xf32> to vector<8x128xf32>
    %382 = arith.addf %379, %381 : vector<8x128xf32>
    %c0_135 = arith.constant 0 : index
    %c0_136 = arith.constant 0 : index
    %383 = vector.load %arg7[%c0_135, %c0_136] : memref<8x128xf32, #tpu.memory_space<vmem>>, vector<8x128xf32>
    tpu.vector_store %arg7[%c0_135, %c0_136], %382 {strides = array<i32>} : memref<8x128xf32, #tpu.memory_space<vmem>>, vector<8x128xf32>,
    return
  }
}

</mosaic_0001>

<bundles_post_ra>
// kernel: tpu_custom_call.1
= control target key start
LH: loop header
LB: loop body
LE: loop exit
PB: predicated region body
PF: predicated region fallthrough
CT: control target
= control target key end

     0   :  { %12 = vsyncpa [#allocation6], 0  ;;  %s3014_s0 = inlined_call_operand.vmem [shape: s32[16], index: 0, kind: input, shape index: {}]   ;;  %s3015_s1 = inlined_call_operand.vmem [shape: f32[20000,32], index: 1, kind: input, shape index: {}]   ;;  %s3016_s2 = inlined_call_operand.vmem [shape: f32[32,128], index: 2, kind: input, shape index: {}]   ;;  %s3017_s3 = inlined_call_operand.vmem [shape: f32[32,128], index: 3, kind: input, shape index: {}]   ;;  %s3018_s4 = inlined_call_operand.vmem [shape: f32[1,128], index: 4, kind: input, shape index: {}]   ;;  %s3019_s5 = inlined_call_operand.vmem [shape: f32[32,128], index: 5, kind: input, shape index: {}]   ;;  %s3020_s6 = inlined_call_operand.vmem [shape: f32[1,128], index: 6, kind: input, shape index: {}]   ;;  %s3021_s7 = inlined_call_operand.hbm [shape: f32[8,128], index: 7, kind: output, shape index: {}]  }
   0x1   :  { %13 = vsyncpa [#allocation5], 0  ;;  %s20_s26 = sshll.u32 %s3014_s0, 4  ;;  %s21_s26 = int_to_ptr.vmem [resolvable:$true] %s20_s26 }
   0x2   :  { %s2622_s27 = scalar_lea.vmem %s21_s26, 16  ;;  %p2627_p1 = scmp.lt.s32.totalorder %s21_s26, %s21_s26 }
   0x3   :  { %p2623_p0 = scmp.ne.s32.totalorder %s21_s26, %s2622_s27  ;;  %p2628_p2 = scmp.lt.s32.totalorder %s2622_s27, %s2622_s27 }
   0x5   :  { %p2629_p3 = por %p2628_p2, %p2627_p1 }
   0x7   :  { %p2630_p4 = pnand %p2629_p3, %p2623_p0 }
   0x9   :  { %2633 = shalt.err (!%p2630_p4)
}
   0xa   :  { %s2692_s28 = smov [#allocation4]  }
   0xb   :  { %23 = dma.vmem_to_smem %s21_s26, 16, %s2692_s28, [#allocation6]  }
   0xc   :  { %2656 = dma.done.wait [#allocation6], 16  }
   0xd   :  { %2657 = vsyncadd [#allocation6], 4294967280 }
   0xe   :  { %37 = sfence }
   0xf   :  { %s38_s29 = sld [smem:[#allocation4]] }
  0x15   :  { %s39_s9 = scalar_lea.vmem %s3015_s1, %s38_s29 }
  0x16   :  { %v57_v0 = vld [vmem:[%s39_s9] sm:$0x1] }
  0x17   :  { %58 = vst [vmem:[#allocation2] sm:$0x1] %v57_v0 }
  0x18   :  { %83 = vsyncadd [#allocation3], 16  ;;  %s2295_s0 = sld [smem:[#allocation4 + $0x1]] }
  0x1e   :  { %s85_s12 = scalar_lea.vmem %s3015_s1, %s2295_s0 }
  0x1f   :  { %v105_v1 = vld [vmem:[%s85_s12] sm:$0x1] }
  0x20   :  { %106 = vst [vmem:[#allocation2 + $0x1] sm:$0x1] %v105_v1 }
  0x21   :  { %131 = vsyncadd [#allocation3 + $0x1], 16  ;;  %s2296_s13 = sld [smem:[#allocation4 + $0x2]] }
  0x27   :  { %s133_s16 = scalar_lea.vmem %s3015_s1, %s2296_s13 }
  0x28   :  { %v153_v2 = vld [vmem:[%s133_s16] sm:$0x1] }
  0x29   :  { %154 = vst [vmem:[#allocation2 + $0x8] sm:$0x1] %v153_v2 }
  0x2a   :  { %179 = vsyncadd [#allocation3 + $0x2], 16  ;;  %s2297_s17 = sld [smem:[#allocation4 + $0x3]] }
  0x30   :  { %s181_s20 = scalar_lea.vmem %s3015_s1, %s2297_s17 }
  0x31   :  { %v201_v3 = vld [vmem:[%s181_s20] sm:$0x1] }
  0x32   :  { %202 = vst [vmem:[#allocation2 + $0x9] sm:$0x1] %v201_v3 }
  0x33   :  { %227 = vsyncadd [#allocation3 + $0x3], 16  ;;  %s2298_s21 = sld [smem:[#allocation4 + $0x4]] }
  0x39   :  { %s229_s24 = scalar_lea.vmem %s3015_s1, %s2298_s21 }
  0x3a   :  { %v249_v4 = vld [vmem:[%s229_s24] sm:$0x1] }
  0x3b   :  { %250 = vst [vmem:[#allocation2 + $0x10] sm:$0x1] %v249_v4 }
  0x3c   :  { %275 = vsyncadd [#allocation3 + $0x4], 16  ;;  %s2299_s25 = sld [smem:[#allocation4 + $0x5]] }
  0x42   :  { %s277_s28 = scalar_lea.vmem %s3015_s1, %s2299_s25 }
  0x43   :  { %v297_v5 = vld [vmem:[%s277_s28] sm:$0x1] }
  0x44   :  { %298 = vst [vmem:[#allocation2 + $0x11] sm:$0x1] %v297_v5 }
  0x45   :  { %323 = vsyncadd [#allocation3 + $0x5], 16  ;;  %s2300_s29 = sld [smem:[#allocation4 + $0x6]] }
  0x4b   :  { %s325_s9 = scalar_lea.vmem %s3015_s1, %s2300_s29 }
  0x4c   :  { %v345_v6 = vld [vmem:[%s325_s9] sm:$0x1] }
  0x4d   :  { %346 = vst [vmem:[#allocation2 + $0x18] sm:$0x1] %v345_v6 }
  0x4e   :  { %371 = vsyncadd [#allocation3 + $0x6], 16  ;;  %s2301_s0 = sld [smem:[#allocation4 + $0x7]] }
  0x54   :  { %s373_s12 = scalar_lea.vmem %s3015_s1, %s2301_s0 }
  0x55   :  { %v393_v7 = vld [vmem:[%s373_s12] sm:$0x1] }
  0x56   :  { %394 = vst [vmem:[#allocation2 + $0x19] sm:$0x1] %v393_v7 }
  0x57   :  { %419 = vsyncadd [#allocation3 + $0x7], 16  ;;  %s2302_s13 = sld [smem:[#allocation4 + $0x8]] }
  0x5d   :  { %s421_s16 = scalar_lea.vmem %s3015_s1, %s2302_s13 }
  0x5e   :  { %v441_v8 = vld [vmem:[%s421_s16] sm:$0x1] }
  0x5f   :  { %442 = vst [vmem:[#allocation2 + $0x20] sm:$0x1] %v441_v8 }
  0x60   :  { %467 = vsyncadd [#allocation3 + $0x8], 16  ;;  %s2303_s17 = sld [smem:[#allocation4 + $0x9]] }
  0x66   :  { %s469_s20 = scalar_lea.vmem %s3015_s1, %s2303_s17 }
  0x67   :  { %v489_v9 = vld [vmem:[%s469_s20] sm:$0x1] }
  0x68   :  { %490 = vst [vmem:[#allocation2 + $0x21] sm:$0x1] %v489_v9 }
  0x69   :  { %515 = vsyncadd [#allocation3 + $0x9], 16  ;;  %s2304_s21 = sld [smem:[#allocation4 + $0xa]] }
  0x6f   :  { %s517_s24 = scalar_lea.vmem %s3015_s1, %s2304_s21 }
  0x70   :  { %v537_v10 = vld [vmem:[%s517_s24] sm:$0x1] }
  0x71   :  { %538 = vst [vmem:[#allocation2 + $0x28] sm:$0x1] %v537_v10 }
  0x72   :  { %563 = vsyncadd [#allocation3 + $0xa], 16  ;;  %s2305_s25 = sld [smem:[#allocation4 + $0xb]] }
  0x78   :  { %s565_s28 = scalar_lea.vmem %s3015_s1, %s2305_s25 }
  0x79   :  { %v585_v11 = vld [vmem:[%s565_s28] sm:$0x1] }
  0x7a   :  { %586 = vst [vmem:[#allocation2 + $0x29] sm:$0x1] %v585_v11 }
  0x7b   :  { %611 = vsyncadd [#allocation3 + $0xb], 16  ;;  %s2306_s29 = sld [smem:[#allocation4 + $0xc]] }
  0x81   :  { %s613_s9 = scalar_lea.vmem %s3015_s1, %s2306_s29 }
  0x82   :  { %v633_v12 = vld [vmem:[%s613_s9] sm:$0x1] }
  0x83   :  { %634 = vst [vmem:[#allocation2 + $0x30] sm:$0x1] %v633_v12 }
  0x84   :  { %659 = vsyncadd [#allocation3 + $0xc], 16  ;;  %s2307_s0 = sld [smem:[#allocation4 + $0xd]] }
  0x8a   :  { %s661_s12 = scalar_lea.vmem %s3015_s1, %s2307_s0 }
  0x8b   :  { %v681_v13 = vld [vmem:[%s661_s12] sm:$0x1] }
  0x8c   :  { %682 = vst [vmem:[#allocation2 + $0x31] sm:$0x1] %v681_v13 }
  0x8d   :  { %707 = vsyncadd [#allocation3 + $0xd], 16  ;;  %s2308_s13 = sld [smem:[#allocation4 + $0xe]] }
  0x93   :  { %s709_s16 = scalar_lea.vmem %s3015_s1, %s2308_s13 }
  0x94   :  { %v729_v14 = vld [vmem:[%s709_s16] sm:$0x1] }
  0x95   :  { %730 = vst [vmem:[#allocation2 + $0x38] sm:$0x1] %v729_v14 }
  0x96   :  { %755 = vsyncadd [#allocation3 + $0xe], 16  ;;  %s2309_s17 = sld [smem:[#allocation4 + $0xf]] }
  0x9c   :  { %s757_s20 = scalar_lea.vmem %s3015_s1, %s2309_s17 }
  0x9d   :  { %v777_v15 = vld [vmem:[%s757_s20] sm:$0x1] }
  0x9e   :  { %778 = vst [vmem:[#allocation2 + $0x39] sm:$0x1] %v777_v15 }
  0x9f   :  { %803 = vsyncadd [#allocation3 + $0xf], 16  ;;  %v804_v16 = vlaneseq  ;;  %v811_v17 = vld [vmem:[%s3017_s3] sm:$0xff]  ;;  %v812_v18 = vld [vmem:[%s3017_s3 + $0x8] sm:$0xff]  ;;  %v2693_v26 = vmov 0.5  }
  0xa0   :  { %v813_v19 = vld [vmem:[%s3017_s3 + $0x10] sm:$0xff]  ;;  %v814_v20 = vld [vmem:[%s3017_s3 + $0x18] sm:$0xff]  ;;  %v815_v21 = vld [vmem:[%s3016_s2] sm:$0xff] }
  0xa1   :  { %v805_v22 = vand.u32 127, %v804_v16  ;;  %v816_v23 = vld [vmem:[%s3016_s2 + $0x8] sm:$0xff]  ;;  %v817_v24 = vld [vmem:[%s3016_s2 + $0x10] sm:$0xff]  ;;  %v818_v25 = vld [vmem:[%s3016_s2 + $0x18] sm:$0xff] }
  0xa3   :  { %vm806_vm0 = vcmp.ge.s32.totalorder %v805_v22, 64  ;;  %vm807_vm1 = vcmp.lt.s32.totalorder %v805_v22, 96 }
  0xa4   :  { %vm808_vm2 = vmand %vm806_vm0, %vm807_vm1 }
  0xa5   :  { %v2815_v27 = vsel %vm808_vm2, 1.0, %v2693_v26  ;;  %v2817_v28 = vsel %vm808_vm2, 0.0, %v2693_v26 }
  0xa6   :  { %2658 = dma.done.wait [#allocation3], 16 }
  0xa7   :  { %2659 = vsyncadd [#allocation3], 4294967280 }
  0xa8   :  { %2660 = dma.done.wait [#allocation3 + $0x1], 16 }
  0xa9   :  { %2661 = vsyncadd [#allocation3 + $0x1], 4294967280 }
  0xaa   :  { %2662 = dma.done.wait [#allocation3 + $0x2], 16 }
  0xab   :  { %2663 = vsyncadd [#allocation3 + $0x2], 4294967280 }
  0xac   :  { %2664 = dma.done.wait [#allocation3 + $0x3], 16 }
  0xad   :  { %2665 = vsyncadd [#allocation3 + $0x3], 4294967280 }
  0xae   :  { %2666 = dma.done.wait [#allocation3 + $0x4], 16 }
  0xaf   :  { %2667 = vsyncadd [#allocation3 + $0x4], 4294967280 }
  0xb0   :  { %2668 = dma.done.wait [#allocation3 + $0x5], 16 }
  0xb1   :  { %2669 = vsyncadd [#allocation3 + $0x5], 4294967280 }
  0xb2   :  { %2670 = dma.done.wait [#allocation3 + $0x6], 16 }
  0xb3   :  { %2671 = vsyncadd [#allocation3 + $0x6], 4294967280 }
  0xb4   :  { %2672 = dma.done.wait [#allocation3 + $0x7], 16 }
  0xb5   :  { %2673 = vsyncadd [#allocation3 + $0x7], 4294967280 }
  0xb6   :  { %2674 = dma.done.wait [#allocation3 + $0x8], 16 }
  0xb7   :  { %2675 = vsyncadd [#allocation3 + $0x8], 4294967280 }
  0xb8   :  { %2676 = dma.done.wait [#allocation3 + $0x9], 16 }
  0xb9   :  { %2677 = vsyncadd [#allocation3 + $0x9], 4294967280 }
  0xba   :  { %2678 = dma.done.wait [#allocation3 + $0xa], 16 }
  0xbb   :  { %2679 = vsyncadd [#allocation3 + $0xa], 4294967280 }
  0xbc   :  { %2680 = dma.done.wait [#allocation3 + $0xb], 16 }
  0xbd   :  { %2681 = vsyncadd [#allocation3 + $0xb], 4294967280 }
  0xbe   :  { %2682 = dma.done.wait [#allocation3 + $0xc], 16 }
  0xbf   :  { %2683 = vsyncadd [#allocation3 + $0xc], 4294967280 }
  0xc0   :  { %2684 = dma.done.wait [#allocation3 + $0xd], 16 }
  0xc1   :  { %2685 = vsyncadd [#allocation3 + $0xd], 4294967280 }
  0xc2   :  { %2686 = dma.done.wait [#allocation3 + $0xe], 16 }
  0xc3   :  { %2687 = vsyncadd [#allocation3 + $0xe], 4294967280 }
  0xc4   :  { %2688 = dma.done.wait [#allocation3 + $0xf], 16 }
  0xc5   :  { %2689 = vsyncadd [#allocation3 + $0xf], 4294967280  ;;  %v2520_v29 = vpack.c.bf16 %v816_v23, %v815_v21  ;;  %v2819_v30 = vpack.c.bf16 %v812_v18, %v811_v17  ;;  %v2524_v31 = vpack.c.bf16 %v818_v25, %v817_v24  ;;  %v2694_v32 = vmov 0.0|0.0   ;;  %v852_v39 = vld [vmem:[#allocation2] sm:$0xff]  ;;  %v853_v40 = vld [vmem:[#allocation2 + $0x8] sm:$0xff]  ;;  %s2697_s12 = smov 64  }
  0xc6   :  { %2528 = vmatprep.subr.bf16.mxu1 %v2694_v32  ;;  %v2822_v33 = vshrl.u32 %v804_v16, 7  ;;  %v2825_v34 = vpack.c.bf16 %v814_v20, %v813_v19  ;;  %vm2695_vm3 = vmmov 0   ;;  %v2696_v37 = vmov 0.0   ;;  %v2851_v43 = vld [vmem:[%s3018_s4] ss:$0 sm:$0xff]  ;;  %s2698_s4 = smov 32  }
  0xc7   :  { %2521 = vmatprep.subr.bf16.mxu0 %v2520_v29  ;;  %2530 = vmatpush3.bf16.msra.mxu1 %v2819_v30  ;;  %vm987_vm5 = vcmask 261120   ;;  %v854_v18 = vld [vmem:[#allocation2 + $0x10] sm:$0xff]  ;;  %v855_v20 = vld [vmem:[#allocation2 + $0x18] sm:$0xff]  ;;  %v856_v22 = vld [vmem:[#allocation2 + $0x20] sm:$0xff] }
  0xc8   :  { %2523 = vmatpush3.bf16.msra.mxu0 %v2520_v29  ;;  %2531 = vmatprep.subr.bf16.mxu1 %v2694_v32  ;;  %v873_v35 = vand.u32 7, %v2822_v33  ;;  %v862_v36 = vadd.s32 8, %v2822_v33  ;;  %v863_v12 = vadd.s32 16, %v2822_v33  ;;  %v864_v13 = vadd.s32 24, %v2822_v33 }
  0xc9   :  { %2525 = vmatprep.subr.bf16.mxu0 %v2524_v31  ;;  %2429 = vmatprep.mubr.msk.f32.mxu1 %vm2695_vm3, %v2696_v37  ;;  %v865_v14 = vadd.s32 32, %v2822_v33  ;;  %v866_v15 = vadd.s32 40, %v2822_v33  ;;  %v867_v16 = vadd.s32 48, %v2822_v33  ;;  %v868_v17 = vadd.s32 56, %v2822_v33  ;;  %v858_v33 = vld [vmem:[#allocation2 + $0x30] sm:$0xff] }
  0xca   :  { %vm965_vm4 = vcmp.lt.s32.totalorder %v873_v35, 2  ;;  %v880_v38 = vand.u32 7, %v862_v36  ;;  %v887_v19 = vand.u32 7, %v863_v12  ;;  %v894_v21 = vand.u32 7, %v864_v13  ;;  %v857_v36 = vld [vmem:[#allocation2 + $0x28] sm:$0xff] }
  0xcb   :  { %2533 = vmatpush3.bf16.msra.mxu1 %v2825_v34  ;;  %v973_v41 = vsel %vm965_vm4, %v852_v39, 0.0  ;;  %v901_v23 = vand.u32 7, %v865_v14  ;;  %v908_v24 = vand.u32 7, %v866_v15  ;;  %v915_v25 = vand.u32 7, %v867_v16 }
  0xcc   :  { %2527 = vmatpush3.bf16.msra.mxu0 %v2524_v31  ;;  %vm966_vm6 = vcmp.lt.s32.totalorder %v880_v38, 2  ;;  %2534 = vmatprep.subr.bf16.mxu1 %v2694_v32  ;;  %vm967_vm7 = vcmp.lt.s32.totalorder %v887_v19, 2  ;;  %vm968_vm8 = vcmp.lt.s32.totalorder %v894_v21, 2  ;;  %v922_v26 = vand.u32 7, %v868_v17 }
  0xcd   :  { %v974_v42 = vsel %vm966_vm6, %v853_v40, 0.0  ;;  %2540 = vmatprep.subr.bf16.mxu0 %v2694_v32  ;;  %2409 = vmatprep.mubr.msk.f32.mxu0 %vm987_vm5, %v973_v41  ;;  %vm969_vm9 = vcmp.lt.s32.totalorder %v901_v23, 2  ;;  %v975_v29 = vsel %vm967_vm7, %v854_v18, 0.0  ;;  %v976_v31 = vsel %vm968_vm8, %v855_v20, 0.0  ;;  %v859_v40 = vld [vmem:[#allocation2 + $0x38] sm:$0xff] }
  0xce   :  { %2430 = vmatmul.mubr.f32.vlgmr.msra.gmra.mrb[0].mxu1 %v2696_v37  ;;  %v977_v35 = vsel %vm969_vm9, %v856_v22, 0.0  ;;  %vm970_vm10 = vcmp.lt.s32.totalorder %v908_v24, 2  ;;  %vm971_vm11 = vcmp.lt.s32.totalorder %v915_v25, 2  ;;  %vm972_vm12 = vcmp.lt.s32.totalorder %v922_v26, 2 }
  0xcf   :  { %2410 = vmatmul.mubr.msk.f32.vlgmr.msra.gmra.mrb[0].mxu0 %vm987_vm5, %v974_v42  ;;  %2536 = vmatpush3.bf16.msra.mxu1 %v2819_v30  ;;  %v978_v38 = vsel %vm970_vm10, %v857_v36, 0.0  ;;  %v979_v39 = vsel %vm971_vm11, %v858_v33, 0.0  ;;  %v980_v42 = vsel %vm972_vm12, %v859_v40, 0.0 }
  0xd0   :  { %2537 = vmatprep.subr.bf16.mxu1 %v2694_v32  ;;  %2440 = vmatprep.mubr.msk.f32.mxu1 %vm2695_vm3, %v2696_v37 }
  0xd1   :  { %2542 = vmatpush3.bf16.msra.mxu0 %v2819_v30  ;;  %2412 = vmatprep.mubr.msk.f32.mxu0 %vm987_vm5, %v975_v29 }
  0xd2   :  { %2543 = vmatprep.subr.bf16.mxu0 %v2694_v32 }
  0xd3   :  { %2539 = vmatpush3.bf16.msra.mxu1 %v2825_v34  ;;  %2413 = vmatmul.mubr.msk.f32.gmra.mrb[2].mxu0 %vm987_vm5, %v976_v31 }
  0xd4   :  { %2546 = vmatprep.subr.bf16.mxu1 %v2694_v32  ;;  %2415 = vmatprep.mubr.msk.f32.mxu0 %vm987_vm5, %v977_v35 }
  0xd5   :  { %2545 = vmatpush3.bf16.msra.mxu0 %v2825_v34 }
  0xd6   :  { %2552 = vmatprep.subr.bf16.mxu0 %v2694_v32 }
  0xd7   :  { %2416 = vmatmul.mubr.msk.f32.gmra.mrb[4].mxu0 %vm987_vm5, %v978_v38 }
  0xd8   :  { %2418 = vmatprep.mubr.msk.f32.mxu0 %vm987_vm5, %v979_v39 }
  0xdb   :  { %2419 = vmatmul.mubr.msk.f32.gmra.mrb[6].mxu0 %vm987_vm5, %v980_v42 }
  0xdc   :  { %2451 = vmatprep.mubr.msk.f32.mxu0 %vm2695_vm3, %v2696_v37 }
 0x1a1   :  { %v1186_v44 = vpop.f32.mrb[0].mxu1 }
 0x1a2   :  { %v2411_v45 = vpop.f32.mrb[0].mxu0  ;;  %v2431_v46 = vpop.f32.mrb[1].mxu1 }
 0x1a3   :  { %v1078_v47 = vpop.f32.mrb[1].mxu0  ;;  %v1084_v63 = vadd.f32 %v2411_v45, %v2851_v43 }
 0x1a4   :  { %v1079_v48 = vadd.f32 %v2851_v43, %v1078_v47 }
 0x1a6   :  { %v1190_v49 = vadd.f32 %v1186_v44, %v1079_v48  ;;  %v2414_v46 = vpop.f32.mrb[2].mxu0 }
 0x1a7   :  { %v1088_v47 = vpop.f32.mrb[3].mxu0 }
 0x1a8   :  { %v1191_v50 = vmul.f32 %v1190_v49, %v2815_v27 }
 0x1aa   :  { %2590 = vtanh.f32 %v1191_v50  ;;  %v2893_v48 = vpop.f32.mrb[4].mxu0 }
 0x1ab   :  { %v2895_v49 = vpop.f32.mrb[5].mxu0 }
 0x1ac   :  { %v1099_v23 = vadd.f32 %v2851_v43, %v2895_v49 }
 0x1ae   :  { %v2897_v50 = vpop.f32.mrb[6].mxu0 }
 0x1b4   :  { %v2591_v51 = vpop.eup %2590 }
 0x1b5   :  { %v1193_v52 = vmul.f32 %v2591_v51, %v2815_v27  ;;  %v2899_v51 = vpop.f32.mrb[7].mxu0 }
 0x1b7   :  { %v1194_v53 = vadd.f32 %v1193_v52, %v2817_v28 }
 0x1b9   :  { %1197 = vrot.lane.b32.xlu0 %v1194_v53, %s2697_s12  ;;  %v1195_v56 = vmul.f32 0.0, %v1194_v53 }
 0x22b   :  { %v1198_v54 = vpop.permute.xlu0 %1197 }
 0x22c   :  { %v1200_v55 = vmul.f32 %v1198_v54, %v1194_v53 }
 0x22e   :  { %1202 = vrot.lane.b32.xlu0 %v1200_v55, %s2698_s4 }
 0x2a0   :  { %v1203_v57 = vpop.permute.xlu0 %1202 }
 0x2a1   :  { %v1205_v58 = vadd.f32 %v1203_v57, %v1195_v56 }
 0x2a3   :  { %2592 = vtanh.f32 %v1205_v58 }
 0x2ad   :  { %v2593_v59 = vpop.eup %2592 }
 0x2ae   :  { %1208 = vrot.lane.b32.xlu1 %v2593_v59, %s2697_s12 }
 0x320   :  { %v1209_v60 = vpop.permute.xlu1 %1208 }
 0x321   :  { %v1211_v61 = vmul.f32 %v1209_v60, %v1194_v53  ;;  %v1089_v53 = vadd.f32 %v2851_v43, %v1088_v47  ;;  %v1104_v47 = vadd.f32 %v2893_v48, %v2851_v43 }
 0x323   :  { %1213 = vrot.lane.b32.xlu1 %v1211_v61, %s2698_s4 }
 0x395   :  { %v1214_v62 = vpop.permute.xlu1 %1213 }
 0x396   :  { %2441 = vmatmul.mubr.msk.f32.vlgmr.msra.gmra.mrb[2].mxu1 %vm987_vm5, %v1214_v62 }
 0x397   :  { %2548 = vmatpush3.bf16.msra.mxu1 %v2819_v30  ;;  %2462 = vmatprep.mubr.msk.f32.mxu1 %vm2695_vm3, %v2696_v37 }
 0x398   :  { %2549 = vmatprep.subr.bf16.mxu1 %v2694_v32 }
 0x39b   :  { %2551 = vmatpush3.bf16.msra.mxu1 %v2825_v34 }
 0x39c   :  { %2558 = vmatprep.subr.bf16.mxu1 %v2694_v32 }
 0x469   :  { %v1283_v0 = vpop.f32.mrb[2].mxu1 }
 0x46a   :  { %v1287_v1 = vadd.f32 %v1283_v0, %v1084_v63  ;;  %v2442_v2 = vpop.f32.mrb[3].mxu1 }
 0x46c   :  { %v1288_v3 = vmul.f32 %v1287_v1, %v2815_v27 }
 0x46e   :  { %2594 = vtanh.f32 %v1288_v3 }
 0x478   :  { %v2595_v4 = vpop.eup %2594 }
 0x479   :  { %v1290_v5 = vmul.f32 %v2595_v4, %v2815_v27 }
 0x47b   :  { %v1291_v6 = vadd.f32 %v1290_v5, %v2817_v28 }
 0x47d   :  { %1294 = vrot.lane.b32.xlu0 %v1291_v6, %s2697_s12  ;;  %v1292_v9 = vmul.f32 %v1291_v6, %v1205_v58 }
 0x4ef   :  { %v1295_v7 = vpop.permute.xlu0 %1294 }
 0x4f0   :  { %v1297_v8 = vmul.f32 %v1295_v7, %v1291_v6 }
 0x4f2   :  { %1299 = vrot.lane.b32.xlu1 %v1297_v8, %s2698_s4 }
 0x564   :  { %v1300_v10 = vpop.permute.xlu1 %1299 }
 0x565   :  { %v2874_v11 = vadd.f32 %v1300_v10, %v1292_v9 }
 0x567   :  { %2596 = vtanh.f32 %v2874_v11 }
 0x571   :  { %v2597_v41 = vpop.eup %2596 }
 0x572   :  { %1305 = vrot.lane.b32.xlu0 %v2597_v41, %s2697_s12 }
 0x5e4   :  { %v1306_v44 = vpop.permute.xlu0 %1305 }
 0x5e5   :  { %v1308_v45 = vmul.f32 %v1306_v44, %v1291_v6  ;;  %v1094_v6 = vadd.f32 %v2414_v46, %v2851_v43 }
 0x5e7   :  { %1310 = vrot.lane.b32.xlu1 %v1308_v45, %s2698_s4 }
 0x659   :  { %v1311_v52 = vpop.permute.xlu1 %1310 }
 0x65a   :  { %2452 = vmatmul.mubr.msk.f32.vlgmr.msra.gmra.mrb[8].mxu0 %vm987_vm5, %v1311_v52 }
 0x65b   :  { %2554 = vmatpush3.bf16.msra.mxu0 %v2819_v30  ;;  %2473 = vmatprep.mubr.msk.f32.mxu0 %vm2695_vm3, %v2696_v37 }
 0x65c   :  { %2555 = vmatprep.subr.bf16.mxu0 %v2694_v32 }
 0x65f   :  { %2557 = vmatpush3.bf16.msra.mxu0 %v2825_v34 }
 0x660   :  { %2564 = vmatprep.subr.bf16.mxu0 %v2694_v32 }
 0x72d   :  { %v1380_v54 = vpop.f32.mrb[8].mxu0 }
 0x72e   :  { %v1384_v55 = vadd.f32 %v1380_v54, %v1089_v53  ;;  %v2453_v56 = vpop.f32.mrb[9].mxu0 }
 0x730   :  { %v1385_v57 = vmul.f32 %v1384_v55, %v2815_v27 }
 0x732   :  { %2598 = vtanh.f32 %v1385_v57 }
 0x73c   :  { %v2599_v58 = vpop.eup %2598 }
 0x73d   :  { %v1387_v59 = vmul.f32 %v2599_v58, %v2815_v27 }
 0x73f   :  { %v1388_v60 = vadd.f32 %v1387_v59, %v2817_v28 }
 0x741   :  { %1391 = vrot.lane.b32.xlu0 %v1388_v60, %s2697_s12  ;;  %v1389_v63 = vmul.f32 %v1388_v60, %v2874_v11 }
 0x7b3   :  { %v1392_v61 = vpop.permute.xlu0 %1391 }
 0x7b4   :  { %v1394_v62 = vmul.f32 %v1392_v61, %v1388_v60 }
 0x7b6   :  { %1396 = vrot.lane.b32.xlu1 %v1394_v62, %s2698_s4 }
 0x828   :  { %v1397_v0 = vpop.permute.xlu1 %1396 }
 0x829   :  { %v1399_v1 = vadd.f32 %v1397_v0, %v1389_v63  ;;  %v1109_v0 = vadd.f32 %v2851_v43, %v2899_v51 }
 0x82b   :  { %2600 = vtanh.f32 %v1399_v1 }
 0x835   :  { %v2601_v2 = vpop.eup %2600 }
 0x836   :  { %1402 = vrot.lane.b32.xlu0 %v2601_v2, %s2697_s12 }
 0x8a8   :  { %v1403_v3 = vpop.permute.xlu0 %1402 }
 0x8a9   :  { %v1405_v4 = vmul.f32 %v1403_v3, %v1388_v60 }
 0x8ab   :  { %1407 = vrot.lane.b32.xlu1 %v1405_v4, %s2698_s4 }
 0x91d   :  { %v1408_v5 = vpop.permute.xlu1 %1407 }
 0x91e   :  { %2463 = vmatmul.mubr.msk.f32.vlgmr.msra.gmra.mrb[4].mxu1 %vm987_vm5, %v1408_v5 }
 0x91f   :  { %2560 = vmatpush3.bf16.msra.mxu1 %v2819_v30  ;;  %2484 = vmatprep.mubr.msk.f32.mxu1 %vm2695_vm3, %v2696_v37 }
 0x920   :  { %2561 = vmatprep.subr.bf16.mxu1 %v2694_v32 }
 0x923   :  { %2563 = vmatpush3.bf16.msra.mxu1 %v2825_v34 }
 0x924   :  { %2570 = vmatprep.subr.bf16.mxu1 %v2694_v32 }
 0x9f1   :  { %v1477_v7 = vpop.f32.mrb[4].mxu1 }
 0x9f2   :  { %v1481_v8 = vadd.f32 %v1477_v7, %v1094_v6  ;;  %v2464_v9 = vpop.f32.mrb[5].mxu1 }
 0x9f4   :  { %v1482_v10 = vmul.f32 %v1481_v8, %v2815_v27 }
 0x9f6   :  { %2602 = vtanh.f32 %v1482_v10 }
 0xa00   :  { %v2603_v11 = vpop.eup %2602 }
 0xa01   :  { %v1484_v12 = vmul.f32 %v2603_v11, %v2815_v27 }
 0xa03   :  { %v1485_v13 = vadd.f32 %v1484_v12, %v2817_v28 }
 0xa05   :  { %1488 = vrot.lane.b32.xlu0 %v1485_v13, %s2697_s12  ;;  %v1486_v16 = vmul.f32 %v1485_v13, %v1399_v1 }
 0xa77   :  { %v1489_v14 = vpop.permute.xlu0 %1488 }
 0xa78   :  { %v1491_v15 = vmul.f32 %v1489_v14, %v1485_v13 }
 0xa7a   :  { %1493 = vrot.lane.b32.xlu1 %v1491_v15, %s2698_s4  ;;  %v1114_v15 = vadd.f32 %v2897_v50, %v2851_v43  ;;  %v1891_v50 = vld [vmem:[%s3019_s5] sm:$0xff] }
 0xaec   :  { %v1494_v17 = vpop.permute.xlu1 %1493 }
 0xaed   :  { %v1496_v18 = vadd.f32 %v1494_v17, %v1486_v16 }
 0xaef   :  { %2604 = vtanh.f32 %v1496_v18 }
 0xaf9   :  { %v2605_v19 = vpop.eup %2604 }
 0xafa   :  { %1499 = vrot.lane.b32.xlu0 %v2605_v19, %s2697_s12 }
 0xb6c   :  { %v1500_v20 = vpop.permute.xlu0 %1499 }
 0xb6d   :  { %v1502_v21 = vmul.f32 %v1500_v20, %v1485_v13 }
 0xb6f   :  { %1504 = vrot.lane.b32.xlu1 %v1502_v21, %s2698_s4 }
 0xbe1   :  { %v1505_v22 = vpop.permute.xlu1 %1504 }
 0xbe2   :  { %2474 = vmatmul.mubr.msk.f32.vlgmr.msra.gmra.mrb[10].mxu0 %vm987_vm5, %v1505_v22 }
 0xbe3   :  { %2566 = vmatpush3.bf16.msra.mxu0 %v2819_v30  ;;  %2495 = vmatprep.mubr.msk.f32.mxu0 %vm2695_vm3, %v2696_v37 }
 0xbe4   :  { %2567 = vmatprep.subr.bf16.mxu0 %v2694_v32 }
 0xbe7   :  { %2569 = vmatpush3.bf16.msra.mxu0 %v2825_v34 }
 0xbe8   :  { %2576 = vmatprep.subr.bf16.mxu0 %v2694_v32 }
 0xcb5   :  { %v1574_v24 = vpop.f32.mrb[10].mxu0 }
 0xcb6   :  { %v1578_v25 = vadd.f32 %v1574_v24, %v1099_v23  ;;  %v2475_v26 = vpop.f32.mrb[11].mxu0 }
 0xcb8   :  { %v1579_v29 = vmul.f32 %v1578_v25, %v2815_v27 }
 0xcba   :  { %2606 = vtanh.f32 %v1579_v29 }
 0xcc4   :  { %v2607_v31 = vpop.eup %2606 }
 0xcc5   :  { %v1581_v35 = vmul.f32 %v2607_v31, %v2815_v27  ;;  %v1894_v31 = vld [vmem:[%s3019_s5 + $0x18] sm:$0xff] }
 0xcc7   :  { %v1582_v36 = vadd.f32 %v1581_v35, %v2817_v28 }
 0xcc9   :  { %1585 = vrot.lane.b32.xlu0 %v1582_v36, %s2697_s12  ;;  %v1583_v39 = vmul.f32 %v1582_v36, %v1496_v18 }
 0xd3b   :  { %v1586_v33 = vpop.permute.xlu0 %1585 }
 0xd3c   :  { %v1588_v38 = vmul.f32 %v1586_v33, %v1582_v36 }
 0xd3e   :  { %1590 = vrot.lane.b32.xlu1 %v1588_v38, %s2698_s4 }
 0xdb0   :  { %v1591_v40 = vpop.permute.xlu1 %1590 }
 0xdb1   :  { %v1593_v41 = vadd.f32 %v1591_v40, %v1583_v39  ;;  %v2326_v40 = vld [vmem:[%s3020_s6] ss:$0 sm:$0xff] }
 0xdb3   :  { %2608 = vtanh.f32 %v1593_v41 }
 0xdbd   :  { %v2609_v42 = vpop.eup %2608 }
 0xdbe   :  { %1596 = vrot.lane.b32.xlu0 %v2609_v42, %s2697_s12 }
 0xe30   :  { %v1597_v44 = vpop.permute.xlu0 %1596 }
 0xe31   :  { %v1599_v45 = vmul.f32 %v1597_v44, %v1582_v36 }
 0xe33   :  { %1601 = vrot.lane.b32.xlu1 %v1599_v45, %s2698_s4 }
 0xea5   :  { %v1602_v46 = vpop.permute.xlu1 %1601 }
 0xea6   :  { %2485 = vmatmul.mubr.msk.f32.vlgmr.msra.gmra.mrb[6].mxu1 %vm987_vm5, %v1602_v46 }
 0xea7   :  { %2572 = vmatpush3.bf16.msra.mxu1 %v2819_v30  ;;  %2506 = vmatprep.mubr.msk.f32.mxu1 %vm2695_vm3, %v2696_v37 }
 0xea8   :  { %2573 = vmatprep.subr.bf16.mxu1 %v2694_v32 }
 0xeab   :  { %2575 = vmatpush3.bf16.msra.mxu1 %v2825_v34 }
 0xf79   :  { %v1671_v49 = vpop.f32.mrb[6].mxu1 }
 0xf7a   :  { %v1675_v52 = vadd.f32 %v1671_v49, %v1104_v47  ;;  %v2486_v53 = vpop.f32.mrb[7].mxu1 }
 0xf7c   :  { %v1676_v54 = vmul.f32 %v1675_v52, %v2815_v27 }
 0xf7e   :  { %2610 = vtanh.f32 %v1676_v54 }
 0xf88   :  { %v2611_v55 = vpop.eup %2610 }
 0xf89   :  { %v1678_v56 = vmul.f32 %v2611_v55, %v2815_v27 }
 0xf8b   :  { %v1679_v30 = vadd.f32 %v1678_v56, %v2817_v28 }
 0xf8d   :  { %1682 = vrot.lane.b32.xlu0 %v1679_v30, %s2697_s12  ;;  %v1680_v34 = vmul.f32 %v1679_v30, %v1593_v41 }
 0xfff   :  { %v1683_v57 = vpop.permute.xlu0 %1682 }
0x1000   :  { %v1685_v58 = vmul.f32 %v1683_v57, %v1679_v30 }
0x1002   :  { %1687 = vrot.lane.b32.xlu1 %v1685_v58, %s2698_s4 }
0x1074   :  { %v1688_v59 = vpop.permute.xlu1 %1687 }
0x1075   :  { %v1690_v48 = vadd.f32 %v1688_v59, %v1680_v34 }
0x1077   :  { %2612 = vtanh.f32 %v1690_v48 }
0x1081   :  { %v2613_v60 = vpop.eup %2612 }
0x1082   :  { %1693 = vrot.lane.b32.xlu0 %v2613_v60, %s2697_s12 }
0x10f4   :  { %v1694_v61 = vpop.permute.xlu0 %1693 }
0x10f5   :  { %v1696_v62 = vmul.f32 %v1694_v61, %v1679_v30 }
0x10f7   :  { %1698 = vrot.lane.b32.xlu1 %v1696_v62, %s2698_s4 }
0x1169   :  { %v1699_v63 = vpop.permute.xlu1 %1698 }
0x116a   :  { %2496 = vmatmul.mubr.msk.f32.vlgmr.msra.gmra.mrb[12].mxu0 %vm987_vm5, %v1699_v63 }
0x116b   :  { %2517 = vmatprep.mubr.msk.f32.mxu0 %vm2695_vm3, %v2696_v37 }
0x123d   :  { %v1768_v1 = vpop.f32.mrb[12].mxu0 }
0x123e   :  { %v1772_v2 = vadd.f32 %v1768_v1, %v1109_v0  ;;  %v2497_v3 = vpop.f32.mrb[13].mxu0 }
0x1240   :  { %v1773_v4 = vmul.f32 %v1772_v2, %v2815_v27 }
0x1242   :  { %2614 = vtanh.f32 %v1773_v4 }
0x124c   :  { %v2615_v5 = vpop.eup %2614 }
0x124d   :  { %v1775_v6 = vmul.f32 %v2615_v5, %v2815_v27 }
0x124f   :  { %v1776_v7 = vadd.f32 %v1775_v6, %v2817_v28 }
0x1251   :  { %1779 = vrot.lane.b32.xlu0 %v1776_v7, %s2697_s12  ;;  %v1777_v37 = vmul.f32 %v1776_v7, %v1690_v48 }
0x12c3   :  { %v1780_v8 = vpop.permute.xlu0 %1779 }
0x12c4   :  { %v1782_v9 = vmul.f32 %v1780_v8, %v1776_v7 }
0x12c6   :  { %1784 = vrot.lane.b32.xlu1 %v1782_v9, %s2698_s4 }
0x1338   :  { %v1785_v10 = vpop.permute.xlu1 %1784 }
0x1339   :  { %v1787_v51 = vadd.f32 %v1785_v10, %v1777_v37 }
0x133b   :  { %2616 = vtanh.f32 %v1787_v51 }
0x1345   :  { %v2617_v11 = vpop.eup %2616 }
0x1346   :  { %1790 = vrot.lane.b32.xlu0 %v2617_v11, %s2697_s12 }
0x13b8   :  { %v1791_v12 = vpop.permute.xlu0 %1790 }
0x13b9   :  { %v1793_v13 = vmul.f32 %v1791_v12, %v1776_v7 }
0x13bb   :  { %1795 = vrot.lane.b32.xlu1 %v1793_v13, %s2698_s4 }
0x142d   :  { %v1796_v14 = vpop.permute.xlu1 %1795 }
0x142e   :  { %2507 = vmatmul.mubr.msk.f32.vlgmr.msra.gmra.mrb[8].mxu1 %vm987_vm5, %v1796_v14 }
0x1501   :  { %v1865_v16 = vpop.f32.mrb[8].mxu1 }
0x1502   :  { %v1869_v17 = vadd.f32 %v1865_v16, %v1114_v15  ;;  %v2508_v18 = vpop.f32.mrb[9].mxu1 }
0x1504   :  { %v1870_v19 = vmul.f32 %v1869_v17, %v2815_v27 }
0x1506   :  { %2618 = vtanh.f32 %v1870_v19 }
0x1510   :  { %v2619_v20 = vpop.eup %2618 }
0x1511   :  { %v1872_v21 = vmul.f32 %v2619_v20, %v2815_v27  ;;  %v1892_v27 = vld [vmem:[%s3019_s5 + $0x8] sm:$0xff] }
0x1512   :  { %v2577_v29 = vpack.c.bf16 %v1892_v27, %v1891_v50 }
0x1513   :  { %v1873_v22 = vadd.f32 %v1872_v21, %v2817_v28  ;;  %v1893_v28 = vld [vmem:[%s3019_s5 + $0x10] sm:$0xff]  ;;  %s2699_s5 = smov [#allocation7]  }
0x1514   :  { %2578 = vmatpush3.bf16.msra.mxu0 %v2577_v29  ;;  %v2580_v35 = vpack.c.bf16 %v1894_v31, %v1893_v28  ;;  %s1984_s23 = sshll.u32 %s2699_s5, 4  ;;  %s1985_s23 = int_to_ptr.vmem [resolvable:$true] %s1984_s23 }
0x1515   :  { %1876 = vrot.lane.b32.xlu0 %v1873_v22, %s2697_s12  ;;  %v1874_v25 = vmul.f32 %v1873_v22, %v1787_v51  ;;  %2579 = vmatprep.subr.bf16.mxu0 %v2694_v32  ;;  %s2634_s24 = scalar_lea.vmem %s1985_s23, 128  ;;  %p2639_p6 = scmp.lt.s32.totalorder %s1985_s23, %s1985_s23 }
0x1516   :  { %p2635_p5 = scmp.ne.s32.totalorder %s1985_s23, %s2634_s24  ;;  %p2640_p7 = scmp.lt.s32.totalorder %s2634_s24, %s2634_s24 }
0x1518   :  { %2581 = vmatpush3.bf16.msra.mxu0 %v2580_v35  ;;  %p2641_p8 = por %p2640_p7, %p2639_p6 }
0x151a   :  { %p2642_p9 = pnand %p2641_p8, %p2635_p5 }
0x1587   :  { %v1877_v23 = vpop.permute.xlu0 %1876 }
0x1588   :  { %v1879_v24 = vmul.f32 %v1877_v23, %v1873_v22 }
0x158a   :  { %1881 = vrot.lane.b32.xlu1 %v1879_v24, %s2698_s4 }
0x15fc   :  { %v1882_v26 = vpop.permute.xlu1 %1881 }
0x15fd   :  { %v1884_v43 = vadd.f32 %v1882_v26, %v1874_v25 }
0x15ff   :  { %2620 = vtanh.f32 %v1884_v43 }
0x1609   :  { %v2621_v36 = vpop.eup %2620 }
0x160a   :  { %1887 = vrot.lane.b32.xlu0 %v2621_v36, %s2697_s12 }
0x167c   :  { %v1888_v33 = vpop.permute.xlu0 %1887 }
0x167d   :  { %v1890_v38 = vmul.f32 %v1888_v33, %v1873_v22 }
0x167f   :  { %1903 = vrot.lane.b32.xlu1 %v1890_v38, %s2698_s4 }
0x16f1   :  { %v1904_v39 = vpop.permute.xlu1 %1903 }
0x16f2   :  { %2518 = vmatmul.mubr.msk.f32.vlgmr.msra.gmra.mrb[14].mxu0 %vm987_vm5, %v1904_v39 }
0x17c5   :  { %v1973_v41 = vpop.f32.mrb[14].mxu0 }
0x17c6   :  { %v1974_v42 = vadd.f32 %v2326_v40, %v1973_v41  ;;  %v2519_v32 = vpop.f32.mrb[15].mxu0 }
0x17c8   :  { %1977 = vst [vmem:[#allocation7] sm:$0xff] %v1974_v42 }
0x17c9   :  { %2645 = shalt.err (!%p2642_p9)
}
0x17ca   :  { %s2646_s27 = scalar_lea.hbm %s3021_s7, 128 }
0x17cb   :  { %p2647_p10 = scmp.ne.s32.totalorder %s3021_s7, %s2646_s27  ;;  %p2650_p11 = scmp.lt.u32.totalorder %s2646_s27, %s3021_s7 }
0x17cd   :  { %p2652_p12 = pnand %p2650_p11, %p2647_p10 }
0x17cf   :  { %2655 = shalt.err (!%p2652_p12)
}
0x17d0   :  { %1987 = dma.vmem_to_hbm [thread:$0]  %s1985_s23, 128, %s3021_s7, [#allocation5]  }
0x17d1   :  { %2690 = dma.done.wait [#allocation5], 128  }
0x17d2   :  { %2691 = vsyncadd [#allocation5], 4294967168 }
0x17d3   :  { %1991 = vsyncpa [#allocation5], 1 }
0x17d4   :  { %1992 = vsyncpa [#allocation6], 1 }
0x17d5   :  { %1993 = vsyncmov [#allocation3] }
0x17d8   :  { %s1994_s9 = vpop.sfrf %1993 }
0x17d9   :  { %p2328_p13 = scmp.ne.s32.totalorder %s1994_s9, 0 }
0x17db   :  { %1998 = shalt.err (%p2328_p13)  }
0x17dc   :  { %2000 = vsyncmov [#allocation3 + $0x1] }
0x17df   :  { %s2001_s0 = vpop.sfrf %2000 }
0x17e0   :  { %p2329_p0 = scmp.ne.s32.totalorder %s2001_s0, 0 }
0x17e2   :  { %2005 = shalt.err (%p2329_p0)  }
0x17e3   :  { %2007 = vsyncmov [#allocation3 + $0x2] }
0x17e6   :  { %s2008_s10 = vpop.sfrf %2007 }
0x17e7   :  { %p2330_p1 = scmp.ne.s32.totalorder %s2008_s10, 0 }
0x17e9   :  { %2012 = shalt.err (%p2330_p1)  }
0x17ea   :  { %2014 = vsyncmov [#allocation3 + $0x3] }
0x17ed   :  { %s2015_s11 = vpop.sfrf %2014 }
0x17ee   :  { %p2331_p2 = scmp.ne.s32.totalorder %s2015_s11, 0 }
0x17f0   :  { %2019 = shalt.err (%p2331_p2)  }
0x17f1   :  { %2021 = vsyncmov [#allocation3 + $0x4] }
0x17f4   :  { %s2022_s7 = vpop.sfrf %2021 }
0x17f5   :  { %p2332_p3 = scmp.ne.s32.totalorder %s2022_s7, 0 }
0x17f7   :  { %2026 = shalt.err (%p2332_p3)  }
0x17f8   :  { %2028 = vsyncmov [#allocation3 + $0x5] }
0x17fb   :  { %s2029_s2 = vpop.sfrf %2028 }
0x17fc   :  { %p2333_p4 = scmp.ne.s32.totalorder %s2029_s2, 0 }
0x17fe   :  { %2033 = shalt.err (%p2333_p4)  }
0x17ff   :  { %2035 = vsyncmov [#allocation3 + $0x6] }
0x1802   :  { %s2036_s3 = vpop.sfrf %2035 }
0x1803   :  { %p2334_p5 = scmp.ne.s32.totalorder %s2036_s3, 0 }
0x1805   :  { %2040 = shalt.err (%p2334_p5)  }
0x1806   :  { %2042 = vsyncmov [#allocation3 + $0x7] }
0x1809   :  { %s2043_s12 = vpop.sfrf %2042 }
0x180a   :  { %p2335_p6 = scmp.ne.s32.totalorder %s2043_s12, 0 }
0x180c   :  { %2047 = shalt.err (%p2335_p6)  }
0x180d   :  { %2049 = vsyncmov [#allocation3 + $0x8] }
0x1810   :  { %s2050_s4 = vpop.sfrf %2049 }
0x1811   :  { %p2336_p7 = scmp.ne.s32.totalorder %s2050_s4, 0 }
0x1813   :  { %2054 = shalt.err (%p2336_p7)  }
0x1814   :  { %2056 = vsyncmov [#allocation3 + $0x9] }
0x1817   :  { %s2057_s13 = vpop.sfrf %2056 }
0x1818   :  { %p2337_p8 = scmp.ne.s32.totalorder %s2057_s13, 0 }
0x181a   :  { %2061 = shalt.err (%p2337_p8)  }
0x181b   :  { %2063 = vsyncmov [#allocation3 + $0xa] }
0x181e   :  { %s2064_s14 = vpop.sfrf %2063 }
0x181f   :  { %p2338_p9 = scmp.ne.s32.totalorder %s2064_s14, 0 }
0x1821   :  { %2068 = shalt.err (%p2338_p9)  }
0x1822   :  { %2070 = vsyncmov [#allocation3 + $0xb] }
0x1825   :  { %s2071_s15 = vpop.sfrf %2070 }
0x1826   :  { %p2339_p10 = scmp.ne.s32.totalorder %s2071_s15, 0 }
0x1828   :  { %2075 = shalt.err (%p2339_p10)  }
0x1829   :  { %2077 = vsyncmov [#allocation3 + $0xc] }
0x182c   :  { %s2078_s16 = vpop.sfrf %2077 }
0x182d   :  { %p2340_p11 = scmp.ne.s32.totalorder %s2078_s16, 0 }
0x182f   :  { %2082 = shalt.err (%p2340_p11)  }
0x1830   :  { %2084 = vsyncmov [#allocation3 + $0xd] }
0x1833   :  { %s2085_s17 = vpop.sfrf %2084 }
0x1834   :  { %p2341_p12 = scmp.ne.s32.totalorder %s2085_s17, 0 }
0x1836   :  { %2089 = shalt.err (%p2341_p12)  }
0x1837   :  { %2091 = vsyncmov [#allocation3 + $0xe] }
0x183a   :  { %s2092_s18 = vpop.sfrf %2091 }
0x183b   :  { %p2342_p13 = scmp.ne.s32.totalorder %s2092_s18, 0 }
0x183d   :  { %2096 = shalt.err (%p2342_p13)  }
0x183e   :  { %2098 = vsyncmov [#allocation3 + $0xf] }
0x1841   :  { %s2099_s19 = vpop.sfrf %2098 }
0x1842   :  { %p2343_p0 = scmp.ne.s32.totalorder %s2099_s19, 0 }
0x1844   :  { %2103 = shalt.err (%p2343_p0)  }

</bundles_post_ra>
